<compile_context>
chip_gen: v7x
topology: tpu7x:2x2x1
jax: 0.10.0
libtpu: 0.0.40
codegen_flags: <defaults>
</compile_context>

<pallas_src>
import functools

import jax
import jax.numpy as jnp
from jax import lax
from jax.experimental import pallas as pl
from jax.experimental.pallas import tpu as pltpu


# ---------------------------------------------------------------------------
# Fused Pallas kernel
# ---------------------------------------------------------------------------

def _bigru_fused_kernel(*refs, B, T, H, num_layers):
    """Fully fused BiGRU forward.

    refs layout (all VMEM; B is the *padded* batch, 2B % 8 == 0):
      [0]                       x2d      (T*B, D0)  time-major flattened input (row = t*B + b)
      [1+4l .. 4+4l] per layer: wih_cat  (D_in, 6H) input->gate weights, cols [fwd r z n | bwd r z n]
                                whh_v    (2H, 3H)   hidden->gate weights, rows [fwd ; bwd]
                                in_bias  (1, 6H)    b_ih + b_hh merged for r,z; b_in for n
                                rec_bias (2, 3H)    zeros for r,z cols; b_hn (row 0 fwd, row 1 bwd)
      [-4] fc_w     (2H, O)
      [-3] fc_b     (1, O)
      [-2+..] out_ref (B, O)
      scratch: gx_scr (T*2B, 3H), act0/act1 (T*B, 2H) ping-pong inter-layer activations
    """
    nL = num_layers
    x_ref = refs[0]
    layer_refs = refs[1:1 + 4 * nL]
    fc_w_ref = refs[1 + 4 * nL]
    fc_b_ref = refs[2 + 4 * nL]
    out_ref = refs[3 + 4 * nL]
    gx_scr = refs[4 + 4 * nL]
    act_scr = (refs[5 + 4 * nL], refs[6 + 4 * nL])

    H2, H3, H6 = 2 * H, 3 * H, 6 * H
    B2 = 2 * B

    # Direction mask built in-kernel (cheap VPU work, no DMA):
    # rows 0:B (fwd) keep cols 0:H, rows B:2B (bwd) keep cols H:2H.
    row = lax.broadcasted_iota(jnp.int32, (B2, H2), 0)
    col = lax.broadcasted_iota(jnp.int32, (B2, H2), 1)
    dir_mask = jnp.where((row < B) == (col < H), 1.0, 0.0).astype(jnp.float32)

    inp = x_ref[...]                             # (T*B, D_in)
    h_f_last = None
    h_b_last = None

    for layer in range(nL):
        wih = layer_refs[4 * layer + 0][...]     # (D_in, 6H)
        whh = layer_refs[4 * layer + 1][...]     # (2H, 3H)
        ib = layer_refs[4 * layer + 2][...]      # (1, 6H)
        rb = layer_refs[4 * layer + 3][...]      # (2, 3H)

        # Hoisted (outside the time loop): per-direction recurrent bias, broadcast to rows.
        rec_bias = jnp.concatenate(
            [jnp.broadcast_to(rb[0:1, :], (B, H3)),
             jnp.broadcast_to(rb[1:2, :], (B, H3))], axis=0)             # (2B, 3H)

        # Hoisted input-gate matmul: all timesteps x both directions in one MXU pass.
        gx_all = jnp.dot(inp, wih, preferred_element_type=jnp.float32) + ib   # (T*B, 6H)

        # One-shot reorder into block-extended, time-interleaved layout so each recurrent
        # step reads a single contiguous (2B, 3H) slice (no per-step concatenate).
        for s in range(T):
            tb = T - 1 - s                                # bwd direction consumes time tb
            gx_scr[s * B2:s * B2 + B, :] = gx_all[s * B:(s + 1) * B, 0:H3]
            gx_scr[s * B2 + B:(s + 1) * B2, :] = gx_all[tb * B:(tb + 1) * B, H3:H6]

        is_last = layer == nL - 1
        out_scr = act_scr[layer % 2]

        # Dense carry: rows 0:B hold h_fwd, rows B:2B hold h_bwd.  h0 = 0 (torch.zeros).
        h = jnp.zeros((B2, H), jnp.float32)

        for s in range(T):                        # fully unrolled: T is small & static
            tb = T - 1 - s
            gx = gx_scr[s * B2:(s + 1) * B2, :]                       # (2B, 3H)

            # Block-extended view of the carry so one (2B,2H)@(2H,3H) dot applies the
            # per-direction recurrent weights.
            h_ext = jnp.concatenate([h, h], axis=1) * dir_mask        # (2B, 2H)
            gh = jnp.dot(h_ext, whh, preferred_element_type=jnp.float32) + rec_bias

            rz = jax.nn.sigmoid(gx[:, 0:H2] + gh[:, 0:H2])            # r & z, both dirs
            r = rz[:, 0:H]
            z = rz[:, H:H2]
            n = jnp.tanh(gx[:, H2:H3] + r * gh[:, H2:H3])             # b_hn inside r*(...)
            h = (1.0 - z) * n + z * h                                 # dense carry

            if not is_last:
                # Layer output stays resident in VMEM scratch for the next layer.
                out_scr[s * B:(s + 1) * B, 0:H] = h[0:B]              # fwd half @ time s
                out_scr[tb * B:(tb + 1) * B, H:H2] = h[B:B2]          # bwd half @ time tb
            else:
                if s == T - 1:
                    h_f_last = h[0:B]          # fwd hidden at final timestep
                if s == 0:
                    h_b_last = h[B:B2]         # bwd hidden for output time T-1

        if not is_last:
            inp = out_scr[...]                 # (T*B, 2H) input for next layer

    # Final Linear fused as epilogue on out[:, -1, :] = [fwd(T-1) | bwd(T-1)].
    last = jnp.concatenate([h_f_last, h_b_last], axis=1)              # (B, 2H)
    out_ref[...] = (
        jnp.dot(last, fc_w_ref[...], preferred_element_type=jnp.float32) + fc_b_ref[...]
    )


# ---------------------------------------------------------------------------
# Host-side weight packing + wrapper
# ---------------------------------------------------------------------------

def _prep_layer_weights(fwd, bwd, hidden_dim):
    H = hidden_dim
    wih_f, whh_f, bih_f, bhh_f = fwd
    wih_b, whh_b, bih_b, bhh_b = bwd

    wih_cat = jnp.concatenate([wih_f, wih_b], axis=1)            # (D_in, 6H)
    whh_v = jnp.concatenate([whh_f, whh_b], axis=0)              # (2H, 3H)

    def merged_in_bias(bih, bhh):
        # r,z: b_ih + b_hh merged; n: only b_in (b_hn must stay inside r*(...)).
        return jnp.concatenate([bih[:, :2 * H] + bhh[:, :2 * H], bih[:, 2 * H:]], axis=1)

    in_bias = jnp.concatenate([merged_in_bias(bih_f, bhh_f),
                               merged_in_bias(bih_b, bhh_b)], axis=1)   # (1, 6H)

    def rec_bias_dir(bhh):
        return jnp.concatenate([jnp.zeros((1, 2 * H), jnp.float32), bhh[:, 2 * H:]], axis=1)

    rec_bias = jnp.concatenate([rec_bias_dir(bhh_f), rec_bias_dir(bhh_b)], axis=0)  # (2, 3H)
    return [wih_cat, whh_v, in_bias, rec_bias]


def bigru_forward(x, params, hidden_dim, num_layers):
    """Equivalent of BiGRU.forward (inference semantics) — one fused Pallas kernel."""
    B, T, D = x.shape
    H = hidden_dim
    O = params["fc_w_t"].shape[1]

    # Pad batch so 2*Bp is a multiple of 8 (fill the 8 sublanes of every per-step vreg).
    Bp = ((B + 3) // 4) * 4
    xf = x.astype(jnp.float32)
    if Bp != B:
        xf = jnp.pad(xf, ((0, Bp - B), (0, 0), (0, 0)))

    # Time-major flattened input (row = t*Bp + b).  One tiny one-off transpose.
    x2d = jnp.transpose(xf, (1, 0, 2)).reshape(T * Bp, D)

    inputs = [x2d]
    for layer in range(num_layers):
        inputs.extend(_prep_layer_weights(params["gru"][layer]["fwd"],
                                          params["gru"][layer]["bwd"], H))
    inputs.append(params["fc_w_t"])
    inputs.append(params["fc_b"])
    # TODO(synk): nn.GRU inter-layer dropout only fires in training mode; inference
    # (identity) semantics are implemented here.

    kernel = functools.partial(_bigru_fused_kernel, B=Bp, T=T, H=H, num_layers=num_layers)
    vmem = pl.BlockSpec(memory_space=pltpu.MemorySpace.VMEM)
    out = pl.pallas_call(
        kernel,
        out_shape=jax.ShapeDtypeStruct((Bp, O), jnp.float32),
        in_specs=[vmem] * len(inputs),
        out_specs=vmem,
        scratch_shapes=[
            pltpu.VMEM((T * 2 * Bp, 3 * H), jnp.float32),   # reordered gate inputs
            pltpu.VMEM((T * Bp, 2 * H), jnp.float32),       # inter-layer activations (ping)
            pltpu.VMEM((T * Bp, 2 * H), jnp.float32),       # inter-layer activations (pong)
        ],
        compiler_params=pltpu.CompilerParams(vmem_limit_bytes=32 * 1024 * 1024),
    )(*inputs)
    return out[:B]


# ---------------------------------------------------------------------------
# Deterministic parameter init (PyTorch-style U(-1/sqrt(H), 1/sqrt(H)))
# ---------------------------------------------------------------------------

def init_params(key, input_dim, hidden_dim, num_layers, output_dim):
    k = 1.0 / float(hidden_dim) ** 0.5
    params = {"gru": []}
    for layer in range(num_layers):
        d_in = input_dim if layer == 0 else 2 * hidden_dim
        layer_p = {}
        for direction in ("fwd", "bwd"):
            key, k1, k2, k3, k4 = jax.random.split(key, 5)
            wih = jax.random.uniform(k1, (d_in, 3 * hidden_dim), jnp.float32, -k, k)
            whh = jax.random.uniform(k2, (hidden_dim, 3 * hidden_dim), jnp.float32, -k, k)
            bih = jax.random.uniform(k3, (1, 3 * hidden_dim), jnp.float32, -k, k)
            bhh = jax.random.uniform(k4, (1, 3 * hidden_dim), jnp.float32, -k, k)
            layer_p[direction] = (wih, whh, bih, bhh)
        params["gru"].append(layer_p)

    key, k1, k2 = jax.random.split(key, 3)
    kf = 1.0 / float(2 * hidden_dim) ** 0.5
    params["fc_w_t"] = jax.random.uniform(k1, (2 * hidden_dim, output_dim), jnp.float32, -kf, kf)
    params["fc_b"] = jax.random.uniform(k2, (1, output_dim), jnp.float32, -kf, kf)
    return params


# ---------------------------------------------------------------------------
# Pure-JAX reference (for correctness check)
# ---------------------------------------------------------------------------

def _gru_layer_ref(x, wih, whh, bih, bhh, H):
    B, T, _ = x.shape

    def step(h, x_t):
        gx = x_t @ wih + bih[0]
        gh = h @ whh + bhh[0]
        r = jax.nn.sigmoid(gx[:, :H] + gh[:, :H])
        z = jax.nn.sigmoid(gx[:, H:2 * H] + gh[:, H:2 * H])
        n = jnp.tanh(gx[:, 2 * H:] + r * gh[:, 2 * H:])
        h_new = (1.0 - z) * n + z * h
        return h_new, h_new

    _, ys = lax.scan(step, jnp.zeros((B, H), jnp.float32), jnp.swapaxes(x, 0, 1))
    return jnp.swapaxes(ys, 0, 1)


def bigru_forward_ref(x, params, hidden_dim, num_layers):
    inp = x.astype(jnp.float32)
    for layer in range(num_layers):
        fp = params["gru"][layer]["fwd"]
        bp = params["gru"][layer]["bwd"]
        out_f = _gru_layer_ref(inp, *fp, hidden_dim)
        out_b = jnp.flip(_gru_layer_ref(jnp.flip(inp, axis=1), *bp, hidden_dim), axis=1)
        inp = jnp.concatenate([out_f, out_b], axis=-1)
    last = inp[:, -1, :]
    return last @ params["fc_w_t"] + params["fc_b"]


# ---------------------------------------------------------------------------
# Main
# ---------------------------------------------------------------------------

if __name__ == "__main__":
    # Small shapes consistent with the module: (batch, seq, input_dim)
    B, T, INPUT_DIM = 2, 8, 9
    HIDDEN_DIM, NUM_LAYERS, OUTPUT_DIM = 32, 2, 6

    root = jax.random.PRNGKey(0)
    k_x, k_p = jax.random.split(root)
    x = jax.random.normal(k_x, (B, T, INPUT_DIM), jnp.float32)
    params = init_params(k_p, INPUT_DIM, HIDDEN_DIM, NUM_LAYERS, OUTPUT_DIM)

    fwd_fn = jax.jit(functools.partial(bigru_forward,
                                       hidden_dim=HIDDEN_DIM, num_layers=NUM_LAYERS))
    out = jax.block_until_ready(fwd_fn(x, params))
    assert out.shape == (B, OUTPUT_DIM)

    ref = jax.block_until_ready(bigru_forward_ref(x, params, HIDDEN_DIM, NUM_LAYERS))
    assert jnp.allclose(out, ref, atol=1e-3, rtol=1e-3), "Pallas output mismatch vs JAX reference"

    print("KERNEL_OK")
</pallas_src>

<mosaic_0001>
module attributes {stable_mosaic.version = 11 : i64} {
  func.func @_bigru_fused_kernel(%arg0: memref<32x9xf32, #tpu.memory_space<vmem>>, %arg1: memref<9x192xf32, #tpu.memory_space<vmem>>, %arg2: memref<64x96xf32, #tpu.memory_space<vmem>>, %arg3: memref<1x192xf32, #tpu.memory_space<vmem>>, %arg4: memref<2x96xf32, #tpu.memory_space<vmem>>, %arg5: memref<64x192xf32, #tpu.memory_space<vmem>>, %arg6: memref<64x96xf32, #tpu.memory_space<vmem>>, %arg7: memref<1x192xf32, #tpu.memory_space<vmem>>, %arg8: memref<2x96xf32, #tpu.memory_space<vmem>>, %arg9: memref<64x6xf32, #tpu.memory_space<vmem>>, %arg10: memref<1x6xf32, #tpu.memory_space<vmem>>, %arg11: memref<4x6xf32, #tpu.memory_space<vmem>>, %arg12: memref<64x96xf32, #tpu.memory_space<vmem>>, %arg13: memref<32x64xf32, #tpu.memory_space<vmem>>, %arg14: memref<32x64xf32, #tpu.memory_space<vmem>>) attributes {dimension_semantics = [], scalar_prefetch = 0 : i64, scratch_operands = 3 : i64, tpu.core_type = #tpu.core_type<tc>} {
    %0 = tpu.iota {dimensions = array<i32: 0>} : vector<8x64xi32>
    %1 = tpu.iota {dimensions = array<i32: 1>} : vector<8x64xi32>
    %c4_i32 = arith.constant 4 : i32
    %2 = vector.broadcast %c4_i32 : i32 to vector<8x64xi32>
    %3 = arith.cmpi slt, %0, %2 : vector<8x64xi32>
    %c32_i32 = arith.constant 32 : i32
    %4 = vector.broadcast %c32_i32 : i32 to vector<8x64xi32>
    %5 = arith.cmpi slt, %1, %4 : vector<8x64xi32>
    %6 = arith.xori %3, %5 : vector<8x64xi1>
    %cst = arith.constant dense<true> : vector<8x64xi1>
    %7 = arith.xori %6, %cst : vector<8x64xi1>
    %cst_0 = arith.constant 1.000000e+00 : f32
    %cst_1 = arith.constant 0.000000e+00 : f32
    %8 = vector.broadcast %cst_0 : f32 to vector<8x64xf32>
    %9 = vector.broadcast %cst_1 : f32 to vector<8x64xf32>
    %10 = arith.select %7, %8, %9 : vector<8x64xi1>, vector<8x64xf32>
    %c0 = arith.constant 0 : index
    %c0_2 = arith.constant 0 : index
    %11 = vector.load %arg0[%c0, %c0_2] : memref<32x9xf32, #tpu.memory_space<vmem>>, vector<32x9xf32>
    %c0_3 = arith.constant 0 : index
    %c0_4 = arith.constant 0 : index
    %12 = vector.load %arg1[%c0_3, %c0_4] : memref<9x192xf32, #tpu.memory_space<vmem>>, vector<9x192xf32>
    %c0_5 = arith.constant 0 : index
    %c0_6 = arith.constant 0 : index
    %13 = vector.load %arg2[%c0_5, %c0_6] : memref<64x96xf32, #tpu.memory_space<vmem>>, vector<64x96xf32>
    %c0_7 = arith.constant 0 : index
    %c0_8 = arith.constant 0 : index
    %14 = vector.load %arg3[%c0_7, %c0_8] : memref<1x192xf32, #tpu.memory_space<vmem>>, vector<1x192xf32>
    %c0_9 = arith.constant 0 : index
    %c0_10 = arith.constant 0 : index
    %15 = vector.load %arg4[%c0_9, %c0_10] : memref<2x96xf32, #tpu.memory_space<vmem>>, vector<2x96xf32>
    %16 = vector.extract_strided_slice %15 {offsets = [0, 0], sizes = [1, 96], strides = [1, 1]} : vector<2x96xf32> to vector<1x96xf32>
    %17 = vector.shape_cast %16 : vector<1x96xf32> to vector<1x96xf32>
    %18 = vector.broadcast %17 : vector<1x96xf32> to vector<4x96xf32>
    %19 = vector.extract_strided_slice %15 {offsets = [1, 0], sizes = [1, 96], strides = [1, 1]} : vector<2x96xf32> to vector<1x96xf32>
    %20 = vector.shape_cast %19 : vector<1x96xf32> to vector<1x96xf32>
    %21 = vector.broadcast %20 : vector<1x96xf32> to vector<4x96xf32>
    %22 = tpu.concatenate %18, %21 in 0 : vector<4x96xf32>, vector<4x96xf32> -> vector<8x96xf32>
    %cst_11 = arith.constant dense<0.000000e+00> : vector<32x192xf32>
    %23 = tpu.matmul %11, %12, %cst_11 {dimension_numbers = #tpu.dot_dimension_numbers<[1], [0], [0], [1], [0, 0, 1, 1], [], []>} : vector<32x9xf32>, vector<9x192xf32>, vector<32x192xf32> -> vector<32x192xf32>
    %24 = vector.broadcast %14 : vector<1x192xf32> to vector<32x192xf32>
    %25 = arith.addf %23, %24 : vector<32x192xf32>
    %26 = vector.extract_strided_slice %25 {offsets = [0, 0], sizes = [4, 96], strides = [1, 1]} : vector<32x192xf32> to vector<4x96xf32>
    %c0_12 = arith.constant 0 : index
    %c0_13 = arith.constant 0 : index
    %27 = vector.load %arg12[%c0_12, %c0_13] : memref<64x96xf32, #tpu.memory_space<vmem>>, vector<4x96xf32>
    tpu.vector_store %arg12[%c0_12, %c0_13], %26 {strides = array<i32>} : memref<64x96xf32, #tpu.memory_space<vmem>>, vector<4x96xf32>,
    %28 = vector.extract_strided_slice %25 {offsets = [28, 96], sizes = [4, 96], strides = [1, 1]} : vector<32x192xf32> to vector<4x96xf32>
    %c4 = arith.constant 4 : index
    %c0_14 = arith.constant 0 : index
    %29 = vector.load %arg12[%c4, %c0_14] : memref<64x96xf32, #tpu.memory_space<vmem>>, vector<4x96xf32>
    tpu.vector_store %arg12[%c4, %c0_14], %28 {strides = array<i32>} : memref<64x96xf32, #tpu.memory_space<vmem>>, vector<4x96xf32>,
    %30 = vector.extract_strided_slice %25 {offsets = [4, 0], sizes = [4, 96], strides = [1, 1]} : vector<32x192xf32> to vector<4x96xf32>
    %c8 = arith.constant 8 : index
    %c0_15 = arith.constant 0 : index
    %31 = vector.load %arg12[%c8, %c0_15] : memref<64x96xf32, #tpu.memory_space<vmem>>, vector<4x96xf32>
    tpu.vector_store %arg12[%c8, %c0_15], %30 {strides = array<i32>} : memref<64x96xf32, #tpu.memory_space<vmem>>, vector<4x96xf32>,
    %32 = vector.extract_strided_slice %25 {offsets = [24, 96], sizes = [4, 96], strides = [1, 1]} : vector<32x192xf32> to vector<4x96xf32>
    %c12 = arith.constant 12 : index
    %c0_16 = arith.constant 0 : index
    %33 = vector.load %arg12[%c12, %c0_16] : memref<64x96xf32, #tpu.memory_space<vmem>>, vector<4x96xf32>
    tpu.vector_store %arg12[%c12, %c0_16], %32 {strides = array<i32>} : memref<64x96xf32, #tpu.memory_space<vmem>>, vector<4x96xf32>,
    %34 = vector.extract_strided_slice %25 {offsets = [8, 0], sizes = [4, 96], strides = [1, 1]} : vector<32x192xf32> to vector<4x96xf32>
    %c16 = arith.constant 16 : index
    %c0_17 = arith.constant 0 : index
    %35 = vector.load %arg12[%c16, %c0_17] : memref<64x96xf32, #tpu.memory_space<vmem>>, vector<4x96xf32>
    tpu.vector_store %arg12[%c16, %c0_17], %34 {strides = array<i32>} : memref<64x96xf32, #tpu.memory_space<vmem>>, vector<4x96xf32>,
    %36 = vector.extract_strided_slice %25 {offsets = [20, 96], sizes = [4, 96], strides = [1, 1]} : vector<32x192xf32> to vector<4x96xf32>
    %c20 = arith.constant 20 : index
    %c0_18 = arith.constant 0 : index
    %37 = vector.load %arg12[%c20, %c0_18] : memref<64x96xf32, #tpu.memory_space<vmem>>, vector<4x96xf32>
    tpu.vector_store %arg12[%c20, %c0_18], %36 {strides = array<i32>} : memref<64x96xf32, #tpu.memory_space<vmem>>, vector<4x96xf32>,
    %38 = vector.extract_strided_slice %25 {offsets = [12, 0], sizes = [4, 96], strides = [1, 1]} : vector<32x192xf32> to vector<4x96xf32>
    %c24 = arith.constant 24 : index
    %c0_19 = arith.constant 0 : index
    %39 = vector.load %arg12[%c24, %c0_19] : memref<64x96xf32, #tpu.memory_space<vmem>>, vector<4x96xf32>
    tpu.vector_store %arg12[%c24, %c0_19], %38 {strides = array<i32>} : memref<64x96xf32, #tpu.memory_space<vmem>>, vector<4x96xf32>,
    %40 = vector.extract_strided_slice %25 {offsets = [16, 96], sizes = [4, 96], strides = [1, 1]} : vector<32x192xf32> to vector<4x96xf32>
    %c28 = arith.constant 28 : index
    %c0_20 = arith.constant 0 : index
    %41 = vector.load %arg12[%c28, %c0_20] : memref<64x96xf32, #tpu.memory_space<vmem>>, vector<4x96xf32>
    tpu.vector_store %arg12[%c28, %c0_20], %40 {strides = array<i32>} : memref<64x96xf32, #tpu.memory_space<vmem>>, vector<4x96xf32>,
    %42 = vector.extract_strided_slice %25 {offsets = [16, 0], sizes = [4, 96], strides = [1, 1]} : vector<32x192xf32> to vector<4x96xf32>
    %c32 = arith.constant 32 : index
    %c0_21 = arith.constant 0 : index
    %43 = vector.load %arg12[%c32, %c0_21] : memref<64x96xf32, #tpu.memory_space<vmem>>, vector<4x96xf32>
    tpu.vector_store %arg12[%c32, %c0_21], %42 {strides = array<i32>} : memref<64x96xf32, #tpu.memory_space<vmem>>, vector<4x96xf32>,
    %44 = vector.extract_strided_slice %25 {offsets = [12, 96], sizes = [4, 96], strides = [1, 1]} : vector<32x192xf32> to vector<4x96xf32>
    %c36 = arith.constant 36 : index
    %c0_22 = arith.constant 0 : index
    %45 = vector.load %arg12[%c36, %c0_22] : memref<64x96xf32, #tpu.memory_space<vmem>>, vector<4x96xf32>
    tpu.vector_store %arg12[%c36, %c0_22], %44 {strides = array<i32>} : memref<64x96xf32, #tpu.memory_space<vmem>>, vector<4x96xf32>,
    %46 = vector.extract_strided_slice %25 {offsets = [20, 0], sizes = [4, 96], strides = [1, 1]} : vector<32x192xf32> to vector<4x96xf32>
    %c40 = arith.constant 40 : index
    %c0_23 = arith.constant 0 : index
    %47 = vector.load %arg12[%c40, %c0_23] : memref<64x96xf32, #tpu.memory_space<vmem>>, vector<4x96xf32>
    tpu.vector_store %arg12[%c40, %c0_23], %46 {strides = array<i32>} : memref<64x96xf32, #tpu.memory_space<vmem>>, vector<4x96xf32>,
    %48 = vector.extract_strided_slice %25 {offsets = [8, 96], sizes = [4, 96], strides = [1, 1]} : vector<32x192xf32> to vector<4x96xf32>
    %c44 = arith.constant 44 : index
    %c0_24 = arith.constant 0 : index
    %49 = vector.load %arg12[%c44, %c0_24] : memref<64x96xf32, #tpu.memory_space<vmem>>, vector<4x96xf32>
    tpu.vector_store %arg12[%c44, %c0_24], %48 {strides = array<i32>} : memref<64x96xf32, #tpu.memory_space<vmem>>, vector<4x96xf32>,
    %50 = vector.extract_strided_slice %25 {offsets = [24, 0], sizes = [4, 96], strides = [1, 1]} : vector<32x192xf32> to vector<4x96xf32>
    %c48 = arith.constant 48 : index
    %c0_25 = arith.constant 0 : index
    %51 = vector.load %arg12[%c48, %c0_25] : memref<64x96xf32, #tpu.memory_space<vmem>>, vector<4x96xf32>
    tpu.vector_store %arg12[%c48, %c0_25], %50 {strides = array<i32>} : memref<64x96xf32, #tpu.memory_space<vmem>>, vector<4x96xf32>,
    %52 = vector.extract_strided_slice %25 {offsets = [4, 96], sizes = [4, 96], strides = [1, 1]} : vector<32x192xf32> to vector<4x96xf32>
    %c52 = arith.constant 52 : index
    %c0_26 = arith.constant 0 : index
    %53 = vector.load %arg12[%c52, %c0_26] : memref<64x96xf32, #tpu.memory_space<vmem>>, vector<4x96xf32>
    tpu.vector_store %arg12[%c52, %c0_26], %52 {strides = array<i32>} : memref<64x96xf32, #tpu.memory_space<vmem>>, vector<4x96xf32>,
    %54 = vector.extract_strided_slice %25 {offsets = [28, 0], sizes = [4, 96], strides = [1, 1]} : vector<32x192xf32> to vector<4x96xf32>
    %c56 = arith.constant 56 : index
    %c0_27 = arith.constant 0 : index
    %55 = vector.load %arg12[%c56, %c0_27] : memref<64x96xf32, #tpu.memory_space<vmem>>, vector<4x96xf32>
    tpu.vector_store %arg12[%c56, %c0_27], %54 {strides = array<i32>} : memref<64x96xf32, #tpu.memory_space<vmem>>, vector<4x96xf32>,
    %56 = vector.extract_strided_slice %25 {offsets = [0, 96], sizes = [4, 96], strides = [1, 1]} : vector<32x192xf32> to vector<4x96xf32>
    %c60 = arith.constant 60 : index
    %c0_28 = arith.constant 0 : index
    %57 = vector.load %arg12[%c60, %c0_28] : memref<64x96xf32, #tpu.memory_space<vmem>>, vector<4x96xf32>
    tpu.vector_store %arg12[%c60, %c0_28], %56 {strides = array<i32>} : memref<64x96xf32, #tpu.memory_space<vmem>>, vector<4x96xf32>,
    %cst_29 = arith.constant 0.000000e+00 : f32
    %58 = vector.broadcast %cst_29 : f32 to vector<8x32xf32>
    %c0_30 = arith.constant 0 : index
    %c0_31 = arith.constant 0 : index
    %59 = vector.load %arg12[%c0_30, %c0_31] : memref<64x96xf32, #tpu.memory_space<vmem>>, vector<8x96xf32>
    %60 = tpu.concatenate %58, %58 in 1 : vector<8x32xf32>, vector<8x32xf32> -> vector<8x64xf32>
    %61 = arith.mulf %60, %10 : vector<8x64xf32>
    %cst_32 = arith.constant dense<0.000000e+00> : vector<8x96xf32>
    %62 = tpu.matmul %61, %13, %cst_32 {dimension_numbers = #tpu.dot_dimension_numbers<[1], [0], [0], [1], [0, 0, 1, 1], [], []>} : vector<8x64xf32>, vector<64x96xf32>, vector<8x96xf32> -> vector<8x96xf32>
    %63 = arith.addf %62, %22 : vector<8x96xf32>
    %64 = vector.extract_strided_slice %59 {offsets = [0, 0], sizes = [8, 64], strides = [1, 1]} : vector<8x96xf32> to vector<8x64xf32>
    %65 = vector.extract_strided_slice %63 {offsets = [0, 0], sizes = [8, 64], strides = [1, 1]} : vector<8x96xf32> to vector<8x64xf32>
    %66 = arith.addf %64, %65 : vector<8x64xf32>
    %67 = arith.negf %66 : vector<8x64xf32>
    %68 = math.exp %67 : vector<8x64xf32>
    %cst_33 = arith.constant 1.000000e+00 : f32
    %69 = vector.broadcast %cst_33 : f32 to vector<8x64xf32>
    %70 = arith.addf %69, %68 : vector<8x64xf32>
    %71 = arith.divf %69, %70 : vector<8x64xf32>
    %72 = vector.extract_strided_slice %71 {offsets = [0, 0], sizes = [8, 32], strides = [1, 1]} : vector<8x64xf32> to vector<8x32xf32>
    %73 = vector.extract_strided_slice %71 {offsets = [0, 32], sizes = [8, 32], strides = [1, 1]} : vector<8x64xf32> to vector<8x32xf32>
    %74 = vector.extract_strided_slice %59 {offsets = [0, 64], sizes = [8, 32], strides = [1, 1]} : vector<8x96xf32> to vector<8x32xf32>
    %75 = vector.extract_strided_slice %63 {offsets = [0, 64], sizes = [8, 32], strides = [1, 1]} : vector<8x96xf32> to vector<8x32xf32>
    %76 = arith.mulf %72, %75 : vector<8x32xf32>
    %77 = arith.addf %74, %76 : vector<8x32xf32>
    %78 = math.tanh %77 : vector<8x32xf32>
    %cst_34 = arith.constant 1.000000e+00 : f32
    %79 = vector.broadcast %cst_34 : f32 to vector<8x32xf32>
    %80 = arith.subf %79, %73 : vector<8x32xf32>
    %81 = arith.mulf %80, %78 : vector<8x32xf32>
    %82 = arith.mulf %73, %58 : vector<8x32xf32>
    %83 = arith.addf %81, %82 : vector<8x32xf32>
    %84 = vector.extract_strided_slice %83 {offsets = [0, 0], sizes = [4, 32], strides = [1, 1]} : vector<8x32xf32> to vector<4x32xf32>
    %c0_35 = arith.constant 0 : index
    %c0_36 = arith.constant 0 : index
    %85 = vector.load %arg13[%c0_35, %c0_36] : memref<32x64xf32, #tpu.memory_space<vmem>>, vector<4x32xf32>
    tpu.vector_store %arg13[%c0_35, %c0_36], %84 {strides = array<i32>} : memref<32x64xf32, #tpu.memory_space<vmem>>, vector<4x32xf32>,
    %86 = vector.extract_strided_slice %83 {offsets = [4, 0], sizes = [4, 32], strides = [1, 1]} : vector<8x32xf32> to vector<4x32xf32>
    %c28_37 = arith.constant 28 : index
    %c32_38 = arith.constant 32 : index
    %87 = vector.load %arg13[%c28_37, %c32_38] : memref<32x64xf32, #tpu.memory_space<vmem>>, vector<4x32xf32>
    tpu.vector_store %arg13[%c28_37, %c32_38], %86 {strides = array<i32>} : memref<32x64xf32, #tpu.memory_space<vmem>>, vector<4x32xf32>,
    %c8_39 = arith.constant 8 : index
    %c0_40 = arith.constant 0 : index
    %88 = vector.load %arg12[%c8_39, %c0_40] : memref<64x96xf32, #tpu.memory_space<vmem>>, vector<8x96xf32>
    %89 = tpu.concatenate %83, %83 in 1 : vector<8x32xf32>, vector<8x32xf32> -> vector<8x64xf32>
    %90 = arith.mulf %89, %10 : vector<8x64xf32>
    %cst_41 = arith.constant dense<0.000000e+00> : vector<8x96xf32>
    %91 = tpu.matmul %90, %13, %cst_41 {dimension_numbers = #tpu.dot_dimension_numbers<[1], [0], [0], [1], [0, 0, 1, 1], [], []>} : vector<8x64xf32>, vector<64x96xf32>, vector<8x96xf32> -> vector<8x96xf32>
    %92 = arith.addf %91, %22 : vector<8x96xf32>
    %93 = vector.extract_strided_slice %88 {offsets = [0, 0], sizes = [8, 64], strides = [1, 1]} : vector<8x96xf32> to vector<8x64xf32>
    %94 = vector.extract_strided_slice %92 {offsets = [0, 0], sizes = [8, 64], strides = [1, 1]} : vector<8x96xf32> to vector<8x64xf32>
    %95 = arith.addf %93, %94 : vector<8x64xf32>
    %96 = arith.negf %95 : vector<8x64xf32>
    %97 = math.exp %96 : vector<8x64xf32>
    %cst_42 = arith.constant 1.000000e+00 : f32
    %98 = vector.broadcast %cst_42 : f32 to vector<8x64xf32>
    %99 = arith.addf %98, %97 : vector<8x64xf32>
    %100 = arith.divf %98, %99 : vector<8x64xf32>
    %101 = vector.extract_strided_slice %100 {offsets = [0, 0], sizes = [8, 32], strides = [1, 1]} : vector<8x64xf32> to vector<8x32xf32>
    %102 = vector.extract_strided_slice %100 {offsets = [0, 32], sizes = [8, 32], strides = [1, 1]} : vector<8x64xf32> to vector<8x32xf32>
    %103 = vector.extract_strided_slice %88 {offsets = [0, 64], sizes = [8, 32], strides = [1, 1]} : vector<8x96xf32> to vector<8x32xf32>
    %104 = vector.extract_strided_slice %92 {offsets = [0, 64], sizes = [8, 32], strides = [1, 1]} : vector<8x96xf32> to vector<8x32xf32>
    %105 = arith.mulf %101, %104 : vector<8x32xf32>
    %106 = arith.addf %103, %105 : vector<8x32xf32>
    %107 = math.tanh %106 : vector<8x32xf32>
    %cst_43 = arith.constant 1.000000e+00 : f32
    %108 = vector.broadcast %cst_43 : f32 to vector<8x32xf32>
    %109 = arith.subf %108, %102 : vector<8x32xf32>
    %110 = arith.mulf %109, %107 : vector<8x32xf32>
    %111 = arith.mulf %102, %83 : vector<8x32xf32>
    %112 = arith.addf %110, %111 : vector<8x32xf32>
    %113 = vector.extract_strided_slice %112 {offsets = [0, 0], sizes = [4, 32], strides = [1, 1]} : vector<8x32xf32> to vector<4x32xf32>
    %c4_44 = arith.constant 4 : index
    %c0_45 = arith.constant 0 : index
    %114 = vector.load %arg13[%c4_44, %c0_45] : memref<32x64xf32, #tpu.memory_space<vmem>>, vector<4x32xf32>
    tpu.vector_store %arg13[%c4_44, %c0_45], %113 {strides = array<i32>} : memref<32x64xf32, #tpu.memory_space<vmem>>, vector<4x32xf32>,
    %115 = vector.extract_strided_slice %112 {offsets = [4, 0], sizes = [4, 32], strides = [1, 1]} : vector<8x32xf32> to vector<4x32xf32>
    %c24_46 = arith.constant 24 : index
    %c32_47 = arith.constant 32 : index
    %116 = vector.load %arg13[%c24_46, %c32_47] : memref<32x64xf32, #tpu.memory_space<vmem>>, vector<4x32xf32>
    tpu.vector_store %arg13[%c24_46, %c32_47], %115 {strides = array<i32>} : memref<32x64xf32, #tpu.memory_space<vmem>>, vector<4x32xf32>,
    %c16_48 = arith.constant 16 : index
    %c0_49 = arith.constant 0 : index
    %117 = vector.load %arg12[%c16_48, %c0_49] : memref<64x96xf32, #tpu.memory_space<vmem>>, vector<8x96xf32>
    %118 = tpu.concatenate %112, %112 in 1 : vector<8x32xf32>, vector<8x32xf32> -> vector<8x64xf32>
    %119 = arith.mulf %118, %10 : vector<8x64xf32>
    %cst_50 = arith.constant dense<0.000000e+00> : vector<8x96xf32>
    %120 = tpu.matmul %119, %13, %cst_50 {dimension_numbers = #tpu.dot_dimension_numbers<[1], [0], [0], [1], [0, 0, 1, 1], [], []>} : vector<8x64xf32>, vector<64x96xf32>, vector<8x96xf32> -> vector<8x96xf32>
    %121 = arith.addf %120, %22 : vector<8x96xf32>
    %122 = vector.extract_strided_slice %117 {offsets = [0, 0], sizes = [8, 64], strides = [1, 1]} : vector<8x96xf32> to vector<8x64xf32>
    %123 = vector.extract_strided_slice %121 {offsets = [0, 0], sizes = [8, 64], strides = [1, 1]} : vector<8x96xf32> to vector<8x64xf32>
    %124 = arith.addf %122, %123 : vector<8x64xf32>
    %125 = arith.negf %124 : vector<8x64xf32>
    %126 = math.exp %125 : vector<8x64xf32>
    %cst_51 = arith.constant 1.000000e+00 : f32
    %127 = vector.broadcast %cst_51 : f32 to vector<8x64xf32>
    %128 = arith.addf %127, %126 : vector<8x64xf32>
    %129 = arith.divf %127, %128 : vector<8x64xf32>
    %130 = vector.extract_strided_slice %129 {offsets = [0, 0], sizes = [8, 32], strides = [1, 1]} : vector<8x64xf32> to vector<8x32xf32>
    %131 = vector.extract_strided_slice %129 {offsets = [0, 32], sizes = [8, 32], strides = [1, 1]} : vector<8x64xf32> to vector<8x32xf32>
    %132 = vector.extract_strided_slice %117 {offsets = [0, 64], sizes = [8, 32], strides = [1, 1]} : vector<8x96xf32> to vector<8x32xf32>
    %133 = vector.extract_strided_slice %121 {offsets = [0, 64], sizes = [8, 32], strides = [1, 1]} : vector<8x96xf32> to vector<8x32xf32>
    %134 = arith.mulf %130, %133 : vector<8x32xf32>
    %135 = arith.addf %132, %134 : vector<8x32xf32>
    %136 = math.tanh %135 : vector<8x32xf32>
    %cst_52 = arith.constant 1.000000e+00 : f32
    %137 = vector.broadcast %cst_52 : f32 to vector<8x32xf32>
    %138 = arith.subf %137, %131 : vector<8x32xf32>
    %139 = arith.mulf %138, %136 : vector<8x32xf32>
    %140 = arith.mulf %131, %112 : vector<8x32xf32>
    %141 = arith.addf %139, %140 : vector<8x32xf32>
    %142 = vector.extract_strided_slice %141 {offsets = [0, 0], sizes = [4, 32], strides = [1, 1]} : vector<8x32xf32> to vector<4x32xf32>
    %c8_53 = arith.constant 8 : index
    %c0_54 = arith.constant 0 : index
    %143 = vector.load %arg13[%c8_53, %c0_54] : memref<32x64xf32, #tpu.memory_space<vmem>>, vector<4x32xf32>
    tpu.vector_store %arg13[%c8_53, %c0_54], %142 {strides = array<i32>} : memref<32x64xf32, #tpu.memory_space<vmem>>, vector<4x32xf32>,
    %144 = vector.extract_strided_slice %141 {offsets = [4, 0], sizes = [4, 32], strides = [1, 1]} : vector<8x32xf32> to vector<4x32xf32>
    %c20_55 = arith.constant 20 : index
    %c32_56 = arith.constant 32 : index
    %145 = vector.load %arg13[%c20_55, %c32_56] : memref<32x64xf32, #tpu.memory_space<vmem>>, vector<4x32xf32>
    tpu.vector_store %arg13[%c20_55, %c32_56], %144 {strides = array<i32>} : memref<32x64xf32, #tpu.memory_space<vmem>>, vector<4x32xf32>,
    %c24_57 = arith.constant 24 : index
    %c0_58 = arith.constant 0 : index
    %146 = vector.load %arg12[%c24_57, %c0_58] : memref<64x96xf32, #tpu.memory_space<vmem>>, vector<8x96xf32>
    %147 = tpu.concatenate %141, %141 in 1 : vector<8x32xf32>, vector<8x32xf32> -> vector<8x64xf32>
    %148 = arith.mulf %147, %10 : vector<8x64xf32>
    %cst_59 = arith.constant dense<0.000000e+00> : vector<8x96xf32>
    %149 = tpu.matmul %148, %13, %cst_59 {dimension_numbers = #tpu.dot_dimension_numbers<[1], [0], [0], [1], [0, 0, 1, 1], [], []>} : vector<8x64xf32>, vector<64x96xf32>, vector<8x96xf32> -> vector<8x96xf32>
    %150 = arith.addf %149, %22 : vector<8x96xf32>
    %151 = vector.extract_strided_slice %146 {offsets = [0, 0], sizes = [8, 64], strides = [1, 1]} : vector<8x96xf32> to vector<8x64xf32>
    %152 = vector.extract_strided_slice %150 {offsets = [0, 0], sizes = [8, 64], strides = [1, 1]} : vector<8x96xf32> to vector<8x64xf32>
    %153 = arith.addf %151, %152 : vector<8x64xf32>
    %154 = arith.negf %153 : vector<8x64xf32>
    %155 = math.exp %154 : vector<8x64xf32>
    %cst_60 = arith.constant 1.000000e+00 : f32
    %156 = vector.broadcast %cst_60 : f32 to vector<8x64xf32>
    %157 = arith.addf %156, %155 : vector<8x64xf32>
    %158 = arith.divf %156, %157 : vector<8x64xf32>
    %159 = vector.extract_strided_slice %158 {offsets = [0, 0], sizes = [8, 32], strides = [1, 1]} : vector<8x64xf32> to vector<8x32xf32>
    %160 = vector.extract_strided_slice %158 {offsets = [0, 32], sizes = [8, 32], strides = [1, 1]} : vector<8x64xf32> to vector<8x32xf32>
    %161 = vector.extract_strided_slice %146 {offsets = [0, 64], sizes = [8, 32], strides = [1, 1]} : vector<8x96xf32> to vector<8x32xf32>
    %162 = vector.extract_strided_slice %150 {offsets = [0, 64], sizes = [8, 32], strides = [1, 1]} : vector<8x96xf32> to vector<8x32xf32>
    %163 = arith.mulf %159, %162 : vector<8x32xf32>
    %164 = arith.addf %161, %163 : vector<8x32xf32>
    %165 = math.tanh %164 : vector<8x32xf32>
    %cst_61 = arith.constant 1.000000e+00 : f32
    %166 = vector.broadcast %cst_61 : f32 to vector<8x32xf32>
    %167 = arith.subf %166, %160 : vector<8x32xf32>
    %168 = arith.mulf %167, %165 : vector<8x32xf32>
    %169 = arith.mulf %160, %141 : vector<8x32xf32>
    %170 = arith.addf %168, %169 : vector<8x32xf32>
    %171 = vector.extract_strided_slice %170 {offsets = [0, 0], sizes = [4, 32], strides = [1, 1]} : vector<8x32xf32> to vector<4x32xf32>
    %c12_62 = arith.constant 12 : index
    %c0_63 = arith.constant 0 : index
    %172 = vector.load %arg13[%c12_62, %c0_63] : memref<32x64xf32, #tpu.memory_space<vmem>>, vector<4x32xf32>
    tpu.vector_store %arg13[%c12_62, %c0_63], %171 {strides = array<i32>} : memref<32x64xf32, #tpu.memory_space<vmem>>, vector<4x32xf32>,
    %173 = vector.extract_strided_slice %170 {offsets = [4, 0], sizes = [4, 32], strides = [1, 1]} : vector<8x32xf32> to vector<4x32xf32>
    %c16_64 = arith.constant 16 : index
    %c32_65 = arith.constant 32 : index
    %174 = vector.load %arg13[%c16_64, %c32_65] : memref<32x64xf32, #tpu.memory_space<vmem>>, vector<4x32xf32>
    tpu.vector_store %arg13[%c16_64, %c32_65], %173 {strides = array<i32>} : memref<32x64xf32, #tpu.memory_space<vmem>>, vector<4x32xf32>,
    %c32_66 = arith.constant 32 : index
    %c0_67 = arith.constant 0 : index
    %175 = vector.load %arg12[%c32_66, %c0_67] : memref<64x96xf32, #tpu.memory_space<vmem>>, vector<8x96xf32>
    %176 = tpu.concatenate %170, %170 in 1 : vector<8x32xf32>, vector<8x32xf32> -> vector<8x64xf32>
    %177 = arith.mulf %176, %10 : vector<8x64xf32>
    %cst_68 = arith.constant dense<0.000000e+00> : vector<8x96xf32>
    %178 = tpu.matmul %177, %13, %cst_68 {dimension_numbers = #tpu.dot_dimension_numbers<[1], [0], [0], [1], [0, 0, 1, 1], [], []>} : vector<8x64xf32>, vector<64x96xf32>, vector<8x96xf32> -> vector<8x96xf32>
    %179 = arith.addf %178, %22 : vector<8x96xf32>
    %180 = vector.extract_strided_slice %175 {offsets = [0, 0], sizes = [8, 64], strides = [1, 1]} : vector<8x96xf32> to vector<8x64xf32>
    %181 = vector.extract_strided_slice %179 {offsets = [0, 0], sizes = [8, 64], strides = [1, 1]} : vector<8x96xf32> to vector<8x64xf32>
    %182 = arith.addf %180, %181 : vector<8x64xf32>
    %183 = arith.negf %182 : vector<8x64xf32>
    %184 = math.exp %183 : vector<8x64xf32>
    %cst_69 = arith.constant 1.000000e+00 : f32
    %185 = vector.broadcast %cst_69 : f32 to vector<8x64xf32>
    %186 = arith.addf %185, %184 : vector<8x64xf32>
    %187 = arith.divf %185, %186 : vector<8x64xf32>
    %188 = vector.extract_strided_slice %187 {offsets = [0, 0], sizes = [8, 32], strides = [1, 1]} : vector<8x64xf32> to vector<8x32xf32>
    %189 = vector.extract_strided_slice %187 {offsets = [0, 32], sizes = [8, 32], strides = [1, 1]} : vector<8x64xf32> to vector<8x32xf32>
    %190 = vector.extract_strided_slice %175 {offsets = [0, 64], sizes = [8, 32], strides = [1, 1]} : vector<8x96xf32> to vector<8x32xf32>
    %191 = vector.extract_strided_slice %179 {offsets = [0, 64], sizes = [8, 32], strides = [1, 1]} : vector<8x96xf32> to vector<8x32xf32>
    %192 = arith.mulf %188, %191 : vector<8x32xf32>
    %193 = arith.addf %190, %192 : vector<8x32xf32>
    %194 = math.tanh %193 : vector<8x32xf32>
    %cst_70 = arith.constant 1.000000e+00 : f32
    %195 = vector.broadcast %cst_70 : f32 to vector<8x32xf32>
    %196 = arith.subf %195, %189 : vector<8x32xf32>
    %197 = arith.mulf %196, %194 : vector<8x32xf32>
    %198 = arith.mulf %189, %170 : vector<8x32xf32>
    %199 = arith.addf %197, %198 : vector<8x32xf32>
    %200 = vector.extract_strided_slice %199 {offsets = [0, 0], sizes = [4, 32], strides = [1, 1]} : vector<8x32xf32> to vector<4x32xf32>
    %c16_71 = arith.constant 16 : index
    %c0_72 = arith.constant 0 : index
    %201 = vector.load %arg13[%c16_71, %c0_72] : memref<32x64xf32, #tpu.memory_space<vmem>>, vector<4x32xf32>
    tpu.vector_store %arg13[%c16_71, %c0_72], %200 {strides = array<i32>} : memref<32x64xf32, #tpu.memory_space<vmem>>, vector<4x32xf32>,
    %202 = vector.extract_strided_slice %199 {offsets = [4, 0], sizes = [4, 32], strides = [1, 1]} : vector<8x32xf32> to vector<4x32xf32>
    %c12_73 = arith.constant 12 : index
    %c32_74 = arith.constant 32 : index
    %203 = vector.load %arg13[%c12_73, %c32_74] : memref<32x64xf32, #tpu.memory_space<vmem>>, vector<4x32xf32>
    tpu.vector_store %arg13[%c12_73, %c32_74], %202 {strides = array<i32>} : memref<32x64xf32, #tpu.memory_space<vmem>>, vector<4x32xf32>,
    %c40_75 = arith.constant 40 : index
    %c0_76 = arith.constant 0 : index
    %204 = vector.load %arg12[%c40_75, %c0_76] : memref<64x96xf32, #tpu.memory_space<vmem>>, vector<8x96xf32>
    %205 = tpu.concatenate %199, %199 in 1 : vector<8x32xf32>, vector<8x32xf32> -> vector<8x64xf32>
    %206 = arith.mulf %205, %10 : vector<8x64xf32>
    %cst_77 = arith.constant dense<0.000000e+00> : vector<8x96xf32>
    %207 = tpu.matmul %206, %13, %cst_77 {dimension_numbers = #tpu.dot_dimension_numbers<[1], [0], [0], [1], [0, 0, 1, 1], [], []>} : vector<8x64xf32>, vector<64x96xf32>, vector<8x96xf32> -> vector<8x96xf32>
    %208 = arith.addf %207, %22 : vector<8x96xf32>
    %209 = vector.extract_strided_slice %204 {offsets = [0, 0], sizes = [8, 64], strides = [1, 1]} : vector<8x96xf32> to vector<8x64xf32>
    %210 = vector.extract_strided_slice %208 {offsets = [0, 0], sizes = [8, 64], strides = [1, 1]} : vector<8x96xf32> to vector<8x64xf32>
    %211 = arith.addf %209, %210 : vector<8x64xf32>
    %212 = arith.negf %211 : vector<8x64xf32>
    %213 = math.exp %212 : vector<8x64xf32>
    %cst_78 = arith.constant 1.000000e+00 : f32
    %214 = vector.broadcast %cst_78 : f32 to vector<8x64xf32>
    %215 = arith.addf %214, %213 : vector<8x64xf32>
    %216 = arith.divf %214, %215 : vector<8x64xf32>
    %217 = vector.extract_strided_slice %216 {offsets = [0, 0], sizes = [8, 32], strides = [1, 1]} : vector<8x64xf32> to vector<8x32xf32>
    %218 = vector.extract_strided_slice %216 {offsets = [0, 32], sizes = [8, 32], strides = [1, 1]} : vector<8x64xf32> to vector<8x32xf32>
    %219 = vector.extract_strided_slice %204 {offsets = [0, 64], sizes = [8, 32], strides = [1, 1]} : vector<8x96xf32> to vector<8x32xf32>
    %220 = vector.extract_strided_slice %208 {offsets = [0, 64], sizes = [8, 32], strides = [1, 1]} : vector<8x96xf32> to vector<8x32xf32>
    %221 = arith.mulf %217, %220 : vector<8x32xf32>
    %222 = arith.addf %219, %221 : vector<8x32xf32>
    %223 = math.tanh %222 : vector<8x32xf32>
    %cst_79 = arith.constant 1.000000e+00 : f32
    %224 = vector.broadcast %cst_79 : f32 to vector<8x32xf32>
    %225 = arith.subf %224, %218 : vector<8x32xf32>
    %226 = arith.mulf %225, %223 : vector<8x32xf32>
    %227 = arith.mulf %218, %199 : vector<8x32xf32>
    %228 = arith.addf %226, %227 : vector<8x32xf32>
    %229 = vector.extract_strided_slice %228 {offsets = [0, 0], sizes = [4, 32], strides = [1, 1]} : vector<8x32xf32> to vector<4x32xf32>
    %c20_80 = arith.constant 20 : index
    %c0_81 = arith.constant 0 : index
    %230 = vector.load %arg13[%c20_80, %c0_81] : memref<32x64xf32, #tpu.memory_space<vmem>>, vector<4x32xf32>
    tpu.vector_store %arg13[%c20_80, %c0_81], %229 {strides = array<i32>} : memref<32x64xf32, #tpu.memory_space<vmem>>, vector<4x32xf32>,
    %231 = vector.extract_strided_slice %228 {offsets = [4, 0], sizes = [4, 32], strides = [1, 1]} : vector<8x32xf32> to vector<4x32xf32>
    %c8_82 = arith.constant 8 : index
    %c32_83 = arith.constant 32 : index
    %232 = vector.load %arg13[%c8_82, %c32_83] : memref<32x64xf32, #tpu.memory_space<vmem>>, vector<4x32xf32>
    tpu.vector_store %arg13[%c8_82, %c32_83], %231 {strides = array<i32>} : memref<32x64xf32, #tpu.memory_space<vmem>>, vector<4x32xf32>,
    %c48_84 = arith.constant 48 : index
    %c0_85 = arith.constant 0 : index
    %233 = vector.load %arg12[%c48_84, %c0_85] : memref<64x96xf32, #tpu.memory_space<vmem>>, vector<8x96xf32>
    %234 = tpu.concatenate %228, %228 in 1 : vector<8x32xf32>, vector<8x32xf32> -> vector<8x64xf32>
    %235 = arith.mulf %234, %10 : vector<8x64xf32>
    %cst_86 = arith.constant dense<0.000000e+00> : vector<8x96xf32>
    %236 = tpu.matmul %235, %13, %cst_86 {dimension_numbers = #tpu.dot_dimension_numbers<[1], [0], [0], [1], [0, 0, 1, 1], [], []>} : vector<8x64xf32>, vector<64x96xf32>, vector<8x96xf32> -> vector<8x96xf32>
    %237 = arith.addf %236, %22 : vector<8x96xf32>
    %238 = vector.extract_strided_slice %233 {offsets = [0, 0], sizes = [8, 64], strides = [1, 1]} : vector<8x96xf32> to vector<8x64xf32>
    %239 = vector.extract_strided_slice %237 {offsets = [0, 0], sizes = [8, 64], strides = [1, 1]} : vector<8x96xf32> to vector<8x64xf32>
    %240 = arith.addf %238, %239 : vector<8x64xf32>
    %241 = arith.negf %240 : vector<8x64xf32>
    %242 = math.exp %241 : vector<8x64xf32>
    %cst_87 = arith.constant 1.000000e+00 : f32
    %243 = vector.broadcast %cst_87 : f32 to vector<8x64xf32>
    %244 = arith.addf %243, %242 : vector<8x64xf32>
    %245 = arith.divf %243, %244 : vector<8x64xf32>
    %246 = vector.extract_strided_slice %245 {offsets = [0, 0], sizes = [8, 32], strides = [1, 1]} : vector<8x64xf32> to vector<8x32xf32>
    %247 = vector.extract_strided_slice %245 {offsets = [0, 32], sizes = [8, 32], strides = [1, 1]} : vector<8x64xf32> to vector<8x32xf32>
    %248 = vector.extract_strided_slice %233 {offsets = [0, 64], sizes = [8, 32], strides = [1, 1]} : vector<8x96xf32> to vector<8x32xf32>
    %249 = vector.extract_strided_slice %237 {offsets = [0, 64], sizes = [8, 32], strides = [1, 1]} : vector<8x96xf32> to vector<8x32xf32>
    %250 = arith.mulf %246, %249 : vector<8x32xf32>
    %251 = arith.addf %248, %250 : vector<8x32xf32>
    %252 = math.tanh %251 : vector<8x32xf32>
    %cst_88 = arith.constant 1.000000e+00 : f32
    %253 = vector.broadcast %cst_88 : f32 to vector<8x32xf32>
    %254 = arith.subf %253, %247 : vector<8x32xf32>
    %255 = arith.mulf %254, %252 : vector<8x32xf32>
    %256 = arith.mulf %247, %228 : vector<8x32xf32>
    %257 = arith.addf %255, %256 : vector<8x32xf32>
    %258 = vector.extract_strided_slice %257 {offsets = [0, 0], sizes = [4, 32], strides = [1, 1]} : vector<8x32xf32> to vector<4x32xf32>
    %c24_89 = arith.constant 24 : index
    %c0_90 = arith.constant 0 : index
    %259 = vector.load %arg13[%c24_89, %c0_90] : memref<32x64xf32, #tpu.memory_space<vmem>>, vector<4x32xf32>
    tpu.vector_store %arg13[%c24_89, %c0_90], %258 {strides = array<i32>} : memref<32x64xf32, #tpu.memory_space<vmem>>, vector<4x32xf32>,
    %260 = vector.extract_strided_slice %257 {offsets = [4, 0], sizes = [4, 32], strides = [1, 1]} : vector<8x32xf32> to vector<4x32xf32>
    %c4_91 = arith.constant 4 : index
    %c32_92 = arith.constant 32 : index
    %261 = vector.load %arg13[%c4_91, %c32_92] : memref<32x64xf32, #tpu.memory_space<vmem>>, vector<4x32xf32>
    tpu.vector_store %arg13[%c4_91, %c32_92], %260 {strides = array<i32>} : memref<32x64xf32, #tpu.memory_space<vmem>>, vector<4x32xf32>,
    %c56_93 = arith.constant 56 : index
    %c0_94 = arith.constant 0 : index
    %262 = vector.load %arg12[%c56_93, %c0_94] : memref<64x96xf32, #tpu.memory_space<vmem>>, vector<8x96xf32>
    %263 = tpu.concatenate %257, %257 in 1 : vector<8x32xf32>, vector<8x32xf32> -> vector<8x64xf32>
    %264 = arith.mulf %263, %10 : vector<8x64xf32>
    %cst_95 = arith.constant dense<0.000000e+00> : vector<8x96xf32>
    %265 = tpu.matmul %264, %13, %cst_95 {dimension_numbers = #tpu.dot_dimension_numbers<[1], [0], [0], [1], [0, 0, 1, 1], [], []>} : vector<8x64xf32>, vector<64x96xf32>, vector<8x96xf32> -> vector<8x96xf32>
    %266 = arith.addf %265, %22 : vector<8x96xf32>
    %267 = vector.extract_strided_slice %262 {offsets = [0, 0], sizes = [8, 64], strides = [1, 1]} : vector<8x96xf32> to vector<8x64xf32>
    %268 = vector.extract_strided_slice %266 {offsets = [0, 0], sizes = [8, 64], strides = [1, 1]} : vector<8x96xf32> to vector<8x64xf32>
    %269 = arith.addf %267, %268 : vector<8x64xf32>
    %270 = arith.negf %269 : vector<8x64xf32>
    %271 = math.exp %270 : vector<8x64xf32>
    %cst_96 = arith.constant 1.000000e+00 : f32
    %272 = vector.broadcast %cst_96 : f32 to vector<8x64xf32>
    %273 = arith.addf %272, %271 : vector<8x64xf32>
    %274 = arith.divf %272, %273 : vector<8x64xf32>
    %275 = vector.extract_strided_slice %274 {offsets = [0, 0], sizes = [8, 32], strides = [1, 1]} : vector<8x64xf32> to vector<8x32xf32>
    %276 = vector.extract_strided_slice %274 {offsets = [0, 32], sizes = [8, 32], strides = [1, 1]} : vector<8x64xf32> to vector<8x32xf32>
    %277 = vector.extract_strided_slice %262 {offsets = [0, 64], sizes = [8, 32], strides = [1, 1]} : vector<8x96xf32> to vector<8x32xf32>
    %278 = vector.extract_strided_slice %266 {offsets = [0, 64], sizes = [8, 32], strides = [1, 1]} : vector<8x96xf32> to vector<8x32xf32>
    %279 = arith.mulf %275, %278 : vector<8x32xf32>
    %280 = arith.addf %277, %279 : vector<8x32xf32>
    %281 = math.tanh %280 : vector<8x32xf32>
    %cst_97 = arith.constant 1.000000e+00 : f32
    %282 = vector.broadcast %cst_97 : f32 to vector<8x32xf32>
    %283 = arith.subf %282, %276 : vector<8x32xf32>
    %284 = arith.mulf %283, %281 : vector<8x32xf32>
    %285 = arith.mulf %276, %257 : vector<8x32xf32>
    %286 = arith.addf %284, %285 : vector<8x32xf32>
    %287 = vector.extract_strided_slice %286 {offsets = [0, 0], sizes = [4, 32], strides = [1, 1]} : vector<8x32xf32> to vector<4x32xf32>
    %c28_98 = arith.constant 28 : index
    %c0_99 = arith.constant 0 : index
    %288 = vector.load %arg13[%c28_98, %c0_99] : memref<32x64xf32, #tpu.memory_space<vmem>>, vector<4x32xf32>
    tpu.vector_store %arg13[%c28_98, %c0_99], %287 {strides = array<i32>} : memref<32x64xf32, #tpu.memory_space<vmem>>, vector<4x32xf32>,
    %289 = vector.extract_strided_slice %286 {offsets = [4, 0], sizes = [4, 32], strides = [1, 1]} : vector<8x32xf32> to vector<4x32xf32>
    %c0_100 = arith.constant 0 : index
    %c32_101 = arith.constant 32 : index
    %290 = vector.load %arg13[%c0_100, %c32_101] : memref<32x64xf32, #tpu.memory_space<vmem>>, vector<4x32xf32>
    tpu.vector_store %arg13[%c0_100, %c32_101], %289 {strides = array<i32>} : memref<32x64xf32, #tpu.memory_space<vmem>>, vector<4x32xf32>,
    %c0_102 = arith.constant 0 : index
    %c0_103 = arith.constant 0 : index
    %291 = vector.load %arg13[%c0_102, %c0_103] : memref<32x64xf32, #tpu.memory_space<vmem>>, vector<32x64xf32>
    %c0_104 = arith.constant 0 : index
    %c0_105 = arith.constant 0 : index
    %292 = vector.load %arg5[%c0_104, %c0_105] : memref<64x192xf32, #tpu.memory_space<vmem>>, vector<64x192xf32>
    %c0_106 = arith.constant 0 : index
    %c0_107 = arith.constant 0 : index
    %293 = vector.load %arg6[%c0_106, %c0_107] : memref<64x96xf32, #tpu.memory_space<vmem>>, vector<64x96xf32>
    %c0_108 = arith.constant 0 : index
    %c0_109 = arith.constant 0 : index
    %294 = vector.load %arg7[%c0_108, %c0_109] : memref<1x192xf32, #tpu.memory_space<vmem>>, vector<1x192xf32>
    %c0_110 = arith.constant 0 : index
    %c0_111 = arith.constant 0 : index
    %295 = vector.load %arg8[%c0_110, %c0_111] : memref<2x96xf32, #tpu.memory_space<vmem>>, vector<2x96xf32>
    %296 = vector.extract_strided_slice %295 {offsets = [0, 0], sizes = [1, 96], strides = [1, 1]} : vector<2x96xf32> to vector<1x96xf32>
    %297 = vector.shape_cast %296 : vector<1x96xf32> to vector<1x96xf32>
    %298 = vector.broadcast %297 : vector<1x96xf32> to vector<4x96xf32>
    %299 = vector.extract_strided_slice %295 {offsets = [1, 0], sizes = [1, 96], strides = [1, 1]} : vector<2x96xf32> to vector<1x96xf32>
    %300 = vector.shape_cast %299 : vector<1x96xf32> to vector<1x96xf32>
    %301 = vector.broadcast %300 : vector<1x96xf32> to vector<4x96xf32>
    %302 = tpu.concatenate %298, %301 in 0 : vector<4x96xf32>, vector<4x96xf32> -> vector<8x96xf32>
    %cst_112 = arith.constant dense<0.000000e+00> : vector<32x192xf32>
    %303 = tpu.matmul %291, %292, %cst_112 {dimension_numbers = #tpu.dot_dimension_numbers<[1], [0], [0], [1], [0, 0, 1, 1], [], []>} : vector<32x64xf32>, vector<64x192xf32>, vector<32x192xf32> -> vector<32x192xf32>
    %304 = vector.broadcast %294 : vector<1x192xf32> to vector<32x192xf32>
    %305 = arith.addf %303, %304 : vector<32x192xf32>
    %306 = vector.extract_strided_slice %305 {offsets = [0, 0], sizes = [4, 96], strides = [1, 1]} : vector<32x192xf32> to vector<4x96xf32>
    %c0_113 = arith.constant 0 : index
    %c0_114 = arith.constant 0 : index
    %307 = vector.load %arg12[%c0_113, %c0_114] : memref<64x96xf32, #tpu.memory_space<vmem>>, vector<4x96xf32>
    tpu.vector_store %arg12[%c0_113, %c0_114], %306 {strides = array<i32>} : memref<64x96xf32, #tpu.memory_space<vmem>>, vector<4x96xf32>,
    %308 = vector.extract_strided_slice %305 {offsets = [28, 96], sizes = [4, 96], strides = [1, 1]} : vector<32x192xf32> to vector<4x96xf32>
    %c4_115 = arith.constant 4 : index
    %c0_116 = arith.constant 0 : index
    %309 = vector.load %arg12[%c4_115, %c0_116] : memref<64x96xf32, #tpu.memory_space<vmem>>, vector<4x96xf32>
    tpu.vector_store %arg12[%c4_115, %c0_116], %308 {strides = array<i32>} : memref<64x96xf32, #tpu.memory_space<vmem>>, vector<4x96xf32>,
    %310 = vector.extract_strided_slice %305 {offsets = [4, 0], sizes = [4, 96], strides = [1, 1]} : vector<32x192xf32> to vector<4x96xf32>
    %c8_117 = arith.constant 8 : index
    %c0_118 = arith.constant 0 : index
    %311 = vector.load %arg12[%c8_117, %c0_118] : memref<64x96xf32, #tpu.memory_space<vmem>>, vector<4x96xf32>
    tpu.vector_store %arg12[%c8_117, %c0_118], %310 {strides = array<i32>} : memref<64x96xf32, #tpu.memory_space<vmem>>, vector<4x96xf32>,
    %312 = vector.extract_strided_slice %305 {offsets = [24, 96], sizes = [4, 96], strides = [1, 1]} : vector<32x192xf32> to vector<4x96xf32>
    %c12_119 = arith.constant 12 : index
    %c0_120 = arith.constant 0 : index
    %313 = vector.load %arg12[%c12_119, %c0_120] : memref<64x96xf32, #tpu.memory_space<vmem>>, vector<4x96xf32>
    tpu.vector_store %arg12[%c12_119, %c0_120], %312 {strides = array<i32>} : memref<64x96xf32, #tpu.memory_space<vmem>>, vector<4x96xf32>,
    %314 = vector.extract_strided_slice %305 {offsets = [8, 0], sizes = [4, 96], strides = [1, 1]} : vector<32x192xf32> to vector<4x96xf32>
    %c16_121 = arith.constant 16 : index
    %c0_122 = arith.constant 0 : index
    %315 = vector.load %arg12[%c16_121, %c0_122] : memref<64x96xf32, #tpu.memory_space<vmem>>, vector<4x96xf32>
    tpu.vector_store %arg12[%c16_121, %c0_122], %314 {strides = array<i32>} : memref<64x96xf32, #tpu.memory_space<vmem>>, vector<4x96xf32>,
    %316 = vector.extract_strided_slice %305 {offsets = [20, 96], sizes = [4, 96], strides = [1, 1]} : vector<32x192xf32> to vector<4x96xf32>
    %c20_123 = arith.constant 20 : index
    %c0_124 = arith.constant 0 : index
    %317 = vector.load %arg12[%c20_123, %c0_124] : memref<64x96xf32, #tpu.memory_space<vmem>>, vector<4x96xf32>
    tpu.vector_store %arg12[%c20_123, %c0_124], %316 {strides = array<i32>} : memref<64x96xf32, #tpu.memory_space<vmem>>, vector<4x96xf32>,
    %318 = vector.extract_strided_slice %305 {offsets = [12, 0], sizes = [4, 96], strides = [1, 1]} : vector<32x192xf32> to vector<4x96xf32>
    %c24_125 = arith.constant 24 : index
    %c0_126 = arith.constant 0 : index
    %319 = vector.load %arg12[%c24_125, %c0_126] : memref<64x96xf32, #tpu.memory_space<vmem>>, vector<4x96xf32>
    tpu.vector_store %arg12[%c24_125, %c0_126], %318 {strides = array<i32>} : memref<64x96xf32, #tpu.memory_space<vmem>>, vector<4x96xf32>,
    %320 = vector.extract_strided_slice %305 {offsets = [16, 96], sizes = [4, 96], strides = [1, 1]} : vector<32x192xf32> to vector<4x96xf32>
    %c28_127 = arith.constant 28 : index
    %c0_128 = arith.constant 0 : index
    %321 = vector.load %arg12[%c28_127, %c0_128] : memref<64x96xf32, #tpu.memory_space<vmem>>, vector<4x96xf32>
    tpu.vector_store %arg12[%c28_127, %c0_128], %320 {strides = array<i32>} : memref<64x96xf32, #tpu.memory_space<vmem>>, vector<4x96xf32>,
    %322 = vector.extract_strided_slice %305 {offsets = [16, 0], sizes = [4, 96], strides = [1, 1]} : vector<32x192xf32> to vector<4x96xf32>
    %c32_129 = arith.constant 32 : index
    %c0_130 = arith.constant 0 : index
    %323 = vector.load %arg12[%c32_129, %c0_130] : memref<64x96xf32, #tpu.memory_space<vmem>>, vector<4x96xf32>
    tpu.vector_store %arg12[%c32_129, %c0_130], %322 {strides = array<i32>} : memref<64x96xf32, #tpu.memory_space<vmem>>, vector<4x96xf32>,
    %324 = vector.extract_strided_slice %305 {offsets = [12, 96], sizes = [4, 96], strides = [1, 1]} : vector<32x192xf32> to vector<4x96xf32>
    %c36_131 = arith.constant 36 : index
    %c0_132 = arith.constant 0 : index
    %325 = vector.load %arg12[%c36_131, %c0_132] : memref<64x96xf32, #tpu.memory_space<vmem>>, vector<4x96xf32>
    tpu.vector_store %arg12[%c36_131, %c0_132], %324 {strides = array<i32>} : memref<64x96xf32, #tpu.memory_space<vmem>>, vector<4x96xf32>,
    %326 = vector.extract_strided_slice %305 {offsets = [20, 0], sizes = [4, 96], strides = [1, 1]} : vector<32x192xf32> to vector<4x96xf32>
    %c40_133 = arith.constant 40 : index
    %c0_134 = arith.constant 0 : index
    %327 = vector.load %arg12[%c40_133, %c0_134] : memref<64x96xf32, #tpu.memory_space<vmem>>, vector<4x96xf32>
    tpu.vector_store %arg12[%c40_133, %c0_134], %326 {strides = array<i32>} : memref<64x96xf32, #tpu.memory_space<vmem>>, vector<4x96xf32>,
    %328 = vector.extract_strided_slice %305 {offsets = [8, 96], sizes = [4, 96], strides = [1, 1]} : vector<32x192xf32> to vector<4x96xf32>
    %c44_135 = arith.constant 44 : index
    %c0_136 = arith.constant 0 : index
    %329 = vector.load %arg12[%c44_135, %c0_136] : memref<64x96xf32, #tpu.memory_space<vmem>>, vector<4x96xf32>
    tpu.vector_store %arg12[%c44_135, %c0_136], %328 {strides = array<i32>} : memref<64x96xf32, #tpu.memory_space<vmem>>, vector<4x96xf32>,
    %330 = vector.extract_strided_slice %305 {offsets = [24, 0], sizes = [4, 96], strides = [1, 1]} : vector<32x192xf32> to vector<4x96xf32>
    %c48_137 = arith.constant 48 : index
    %c0_138 = arith.constant 0 : index
    %331 = vector.load %arg12[%c48_137, %c0_138] : memref<64x96xf32, #tpu.memory_space<vmem>>, vector<4x96xf32>
    tpu.vector_store %arg12[%c48_137, %c0_138], %330 {strides = array<i32>} : memref<64x96xf32, #tpu.memory_space<vmem>>, vector<4x96xf32>,
    %332 = vector.extract_strided_slice %305 {offsets = [4, 96], sizes = [4, 96], strides = [1, 1]} : vector<32x192xf32> to vector<4x96xf32>
    %c52_139 = arith.constant 52 : index
    %c0_140 = arith.constant 0 : index
    %333 = vector.load %arg12[%c52_139, %c0_140] : memref<64x96xf32, #tpu.memory_space<vmem>>, vector<4x96xf32>
    tpu.vector_store %arg12[%c52_139, %c0_140], %332 {strides = array<i32>} : memref<64x96xf32, #tpu.memory_space<vmem>>, vector<4x96xf32>,
    %334 = vector.extract_strided_slice %305 {offsets = [28, 0], sizes = [4, 96], strides = [1, 1]} : vector<32x192xf32> to vector<4x96xf32>
    %c56_141 = arith.constant 56 : index
    %c0_142 = arith.constant 0 : index
    %335 = vector.load %arg12[%c56_141, %c0_142] : memref<64x96xf32, #tpu.memory_space<vmem>>, vector<4x96xf32>
    tpu.vector_store %arg12[%c56_141, %c0_142], %334 {strides = array<i32>} : memref<64x96xf32, #tpu.memory_space<vmem>>, vector<4x96xf32>,
    %336 = vector.extract_strided_slice %305 {offsets = [0, 96], sizes = [4, 96], strides = [1, 1]} : vector<32x192xf32> to vector<4x96xf32>
    %c60_143 = arith.constant 60 : index
    %c0_144 = arith.constant 0 : index
    %337 = vector.load %arg12[%c60_143, %c0_144] : memref<64x96xf32, #tpu.memory_space<vmem>>, vector<4x96xf32>
    tpu.vector_store %arg12[%c60_143, %c0_144], %336 {strides = array<i32>} : memref<64x96xf32, #tpu.memory_space<vmem>>, vector<4x96xf32>,
    %cst_145 = arith.constant 0.000000e+00 : f32
    %338 = vector.broadcast %cst_145 : f32 to vector<8x32xf32>
    %c0_146 = arith.constant 0 : index
    %c0_147 = arith.constant 0 : index
    %339 = vector.load %arg12[%c0_146, %c0_147] : memref<64x96xf32, #tpu.memory_space<vmem>>, vector<8x96xf32>
    %340 = tpu.concatenate %338, %338 in 1 : vector<8x32xf32>, vector<8x32xf32> -> vector<8x64xf32>
    %341 = arith.mulf %340, %10 : vector<8x64xf32>
    %cst_148 = arith.constant dense<0.000000e+00> : vector<8x96xf32>
    %342 = tpu.matmul %341, %293, %cst_148 {dimension_numbers = #tpu.dot_dimension_numbers<[1], [0], [0], [1], [0, 0, 1, 1], [], []>} : vector<8x64xf32>, vector<64x96xf32>, vector<8x96xf32> -> vector<8x96xf32>
    %343 = arith.addf %342, %302 : vector<8x96xf32>
    %344 = vector.extract_strided_slice %339 {offsets = [0, 0], sizes = [8, 64], strides = [1, 1]} : vector<8x96xf32> to vector<8x64xf32>
    %345 = vector.extract_strided_slice %343 {offsets = [0, 0], sizes = [8, 64], strides = [1, 1]} : vector<8x96xf32> to vector<8x64xf32>
    %346 = arith.addf %344, %345 : vector<8x64xf32>
    %347 = arith.negf %346 : vector<8x64xf32>
    %348 = math.exp %347 : vector<8x64xf32>
    %cst_149 = arith.constant 1.000000e+00 : f32
    %349 = vector.broadcast %cst_149 : f32 to vector<8x64xf32>
    %350 = arith.addf %349, %348 : vector<8x64xf32>
    %351 = arith.divf %349, %350 : vector<8x64xf32>
    %352 = vector.extract_strided_slice %351 {offsets = [0, 0], sizes = [8, 32], strides = [1, 1]} : vector<8x64xf32> to vector<8x32xf32>
    %353 = vector.extract_strided_slice %351 {offsets = [0, 32], sizes = [8, 32], strides = [1, 1]} : vector<8x64xf32> to vector<8x32xf32>
    %354 = vector.extract_strided_slice %339 {offsets = [0, 64], sizes = [8, 32], strides = [1, 1]} : vector<8x96xf32> to vector<8x32xf32>
    %355 = vector.extract_strided_slice %343 {offsets = [0, 64], sizes = [8, 32], strides = [1, 1]} : vector<8x96xf32> to vector<8x32xf32>
    %356 = arith.mulf %352, %355 : vector<8x32xf32>
    %357 = arith.addf %354, %356 : vector<8x32xf32>
    %358 = math.tanh %357 : vector<8x32xf32>
    %cst_150 = arith.constant 1.000000e+00 : f32
    %359 = vector.broadcast %cst_150 : f32 to vector<8x32xf32>
    %360 = arith.subf %359, %353 : vector<8x32xf32>
    %361 = arith.mulf %360, %358 : vector<8x32xf32>
    %362 = arith.mulf %353, %338 : vector<8x32xf32>
    %363 = arith.addf %361, %362 : vector<8x32xf32>
    %364 = vector.extract_strided_slice %363 {offsets = [4, 0], sizes = [4, 32], strides = [1, 1]} : vector<8x32xf32> to vector<4x32xf32>
    %c8_151 = arith.constant 8 : index
    %c0_152 = arith.constant 0 : index
    %365 = vector.load %arg12[%c8_151, %c0_152] : memref<64x96xf32, #tpu.memory_space<vmem>>, vector<8x96xf32>
    %366 = tpu.concatenate %363, %363 in 1 : vector<8x32xf32>, vector<8x32xf32> -> vector<8x64xf32>
    %367 = arith.mulf %366, %10 : vector<8x64xf32>
    %cst_153 = arith.constant dense<0.000000e+00> : vector<8x96xf32>
    %368 = tpu.matmul %367, %293, %cst_153 {dimension_numbers = #tpu.dot_dimension_numbers<[1], [0], [0], [1], [0, 0, 1, 1], [], []>} : vector<8x64xf32>, vector<64x96xf32>, vector<8x96xf32> -> vector<8x96xf32>
    %369 = arith.addf %368, %302 : vector<8x96xf32>
    %370 = vector.extract_strided_slice %365 {offsets = [0, 0], sizes = [8, 64], strides = [1, 1]} : vector<8x96xf32> to vector<8x64xf32>
    %371 = vector.extract_strided_slice %369 {offsets = [0, 0], sizes = [8, 64], strides = [1, 1]} : vector<8x96xf32> to vector<8x64xf32>
    %372 = arith.addf %370, %371 : vector<8x64xf32>
    %373 = arith.negf %372 : vector<8x64xf32>
    %374 = math.exp %373 : vector<8x64xf32>
    %cst_154 = arith.constant 1.000000e+00 : f32
    %375 = vector.broadcast %cst_154 : f32 to vector<8x64xf32>
    %376 = arith.addf %375, %374 : vector<8x64xf32>
    %377 = arith.divf %375, %376 : vector<8x64xf32>
    %378 = vector.extract_strided_slice %377 {offsets = [0, 0], sizes = [8, 32], strides = [1, 1]} : vector<8x64xf32> to vector<8x32xf32>
    %379 = vector.extract_strided_slice %377 {offsets = [0, 32], sizes = [8, 32], strides = [1, 1]} : vector<8x64xf32> to vector<8x32xf32>
    %380 = vector.extract_strided_slice %365 {offsets = [0, 64], sizes = [8, 32], strides = [1, 1]} : vector<8x96xf32> to vector<8x32xf32>
    %381 = vector.extract_strided_slice %369 {offsets = [0, 64], sizes = [8, 32], strides = [1, 1]} : vector<8x96xf32> to vector<8x32xf32>
    %382 = arith.mulf %378, %381 : vector<8x32xf32>
    %383 = arith.addf %380, %382 : vector<8x32xf32>
    %384 = math.tanh %383 : vector<8x32xf32>
    %cst_155 = arith.constant 1.000000e+00 : f32
    %385 = vector.broadcast %cst_155 : f32 to vector<8x32xf32>
    %386 = arith.subf %385, %379 : vector<8x32xf32>
    %387 = arith.mulf %386, %384 : vector<8x32xf32>
    %388 = arith.mulf %379, %363 : vector<8x32xf32>
    %389 = arith.addf %387, %388 : vector<8x32xf32>
    %c16_156 = arith.constant 16 : index
    %c0_157 = arith.constant 0 : index
    %390 = vector.load %arg12[%c16_156, %c0_157] : memref<64x96xf32, #tpu.memory_space<vmem>>, vector<8x96xf32>
    %391 = tpu.concatenate %389, %389 in 1 : vector<8x32xf32>, vector<8x32xf32> -> vector<8x64xf32>
    %392 = arith.mulf %391, %10 : vector<8x64xf32>
    %cst_158 = arith.constant dense<0.000000e+00> : vector<8x96xf32>
    %393 = tpu.matmul %392, %293, %cst_158 {dimension_numbers = #tpu.dot_dimension_numbers<[1], [0], [0], [1], [0, 0, 1, 1], [], []>} : vector<8x64xf32>, vector<64x96xf32>, vector<8x96xf32> -> vector<8x96xf32>
    %394 = arith.addf %393, %302 : vector<8x96xf32>
    %395 = vector.extract_strided_slice %390 {offsets = [0, 0], sizes = [8, 64], strides = [1, 1]} : vector<8x96xf32> to vector<8x64xf32>
    %396 = vector.extract_strided_slice %394 {offsets = [0, 0], sizes = [8, 64], strides = [1, 1]} : vector<8x96xf32> to vector<8x64xf32>
    %397 = arith.addf %395, %396 : vector<8x64xf32>
    %398 = arith.negf %397 : vector<8x64xf32>
    %399 = math.exp %398 : vector<8x64xf32>
    %cst_159 = arith.constant 1.000000e+00 : f32
    %400 = vector.broadcast %cst_159 : f32 to vector<8x64xf32>
    %401 = arith.addf %400, %399 : vector<8x64xf32>
    %402 = arith.divf %400, %401 : vector<8x64xf32>
    %403 = vector.extract_strided_slice %402 {offsets = [0, 0], sizes = [8, 32], strides = [1, 1]} : vector<8x64xf32> to vector<8x32xf32>
    %404 = vector.extract_strided_slice %402 {offsets = [0, 32], sizes = [8, 32], strides = [1, 1]} : vector<8x64xf32> to vector<8x32xf32>
    %405 = vector.extract_strided_slice %390 {offsets = [0, 64], sizes = [8, 32], strides = [1, 1]} : vector<8x96xf32> to vector<8x32xf32>
    %406 = vector.extract_strided_slice %394 {offsets = [0, 64], sizes = [8, 32], strides = [1, 1]} : vector<8x96xf32> to vector<8x32xf32>
    %407 = arith.mulf %403, %406 : vector<8x32xf32>
    %408 = arith.addf %405, %407 : vector<8x32xf32>
    %409 = math.tanh %408 : vector<8x32xf32>
    %cst_160 = arith.constant 1.000000e+00 : f32
    %410 = vector.broadcast %cst_160 : f32 to vector<8x32xf32>
    %411 = arith.subf %410, %404 : vector<8x32xf32>
    %412 = arith.mulf %411, %409 : vector<8x32xf32>
    %413 = arith.mulf %404, %389 : vector<8x32xf32>
    %414 = arith.addf %412, %413 : vector<8x32xf32>
    %c24_161 = arith.constant 24 : index
    %c0_162 = arith.constant 0 : index
    %415 = vector.load %arg12[%c24_161, %c0_162] : memref<64x96xf32, #tpu.memory_space<vmem>>, vector<8x96xf32>
    %416 = tpu.concatenate %414, %414 in 1 : vector<8x32xf32>, vector<8x32xf32> -> vector<8x64xf32>
    %417 = arith.mulf %416, %10 : vector<8x64xf32>
    %cst_163 = arith.constant dense<0.000000e+00> : vector<8x96xf32>
    %418 = tpu.matmul %417, %293, %cst_163 {dimension_numbers = #tpu.dot_dimension_numbers<[1], [0], [0], [1], [0, 0, 1, 1], [], []>} : vector<8x64xf32>, vector<64x96xf32>, vector<8x96xf32> -> vector<8x96xf32>
    %419 = arith.addf %418, %302 : vector<8x96xf32>
    %420 = vector.extract_strided_slice %415 {offsets = [0, 0], sizes = [8, 64], strides = [1, 1]} : vector<8x96xf32> to vector<8x64xf32>
    %421 = vector.extract_strided_slice %419 {offsets = [0, 0], sizes = [8, 64], strides = [1, 1]} : vector<8x96xf32> to vector<8x64xf32>
    %422 = arith.addf %420, %421 : vector<8x64xf32>
    %423 = arith.negf %422 : vector<8x64xf32>
    %424 = math.exp %423 : vector<8x64xf32>
    %cst_164 = arith.constant 1.000000e+00 : f32
    %425 = vector.broadcast %cst_164 : f32 to vector<8x64xf32>
    %426 = arith.addf %425, %424 : vector<8x64xf32>
    %427 = arith.divf %425, %426 : vector<8x64xf32>
    %428 = vector.extract_strided_slice %427 {offsets = [0, 0], sizes = [8, 32], strides = [1, 1]} : vector<8x64xf32> to vector<8x32xf32>
    %429 = vector.extract_strided_slice %427 {offsets = [0, 32], sizes = [8, 32], strides = [1, 1]} : vector<8x64xf32> to vector<8x32xf32>
    %430 = vector.extract_strided_slice %415 {offsets = [0, 64], sizes = [8, 32], strides = [1, 1]} : vector<8x96xf32> to vector<8x32xf32>
    %431 = vector.extract_strided_slice %419 {offsets = [0, 64], sizes = [8, 32], strides = [1, 1]} : vector<8x96xf32> to vector<8x32xf32>
    %432 = arith.mulf %428, %431 : vector<8x32xf32>
    %433 = arith.addf %430, %432 : vector<8x32xf32>
    %434 = math.tanh %433 : vector<8x32xf32>
    %cst_165 = arith.constant 1.000000e+00 : f32
    %435 = vector.broadcast %cst_165 : f32 to vector<8x32xf32>
    %436 = arith.subf %435, %429 : vector<8x32xf32>
    %437 = arith.mulf %436, %434 : vector<8x32xf32>
    %438 = arith.mulf %429, %414 : vector<8x32xf32>
    %439 = arith.addf %437, %438 : vector<8x32xf32>
    %c32_166 = arith.constant 32 : index
    %c0_167 = arith.constant 0 : index
    %440 = vector.load %arg12[%c32_166, %c0_167] : memref<64x96xf32, #tpu.memory_space<vmem>>, vector<8x96xf32>
    %441 = tpu.concatenate %439, %439 in 1 : vector<8x32xf32>, vector<8x32xf32> -> vector<8x64xf32>
    %442 = arith.mulf %441, %10 : vector<8x64xf32>
    %cst_168 = arith.constant dense<0.000000e+00> : vector<8x96xf32>
    %443 = tpu.matmul %442, %293, %cst_168 {dimension_numbers = #tpu.dot_dimension_numbers<[1], [0], [0], [1], [0, 0, 1, 1], [], []>} : vector<8x64xf32>, vector<64x96xf32>, vector<8x96xf32> -> vector<8x96xf32>
    %444 = arith.addf %443, %302 : vector<8x96xf32>
    %445 = vector.extract_strided_slice %440 {offsets = [0, 0], sizes = [8, 64], strides = [1, 1]} : vector<8x96xf32> to vector<8x64xf32>
    %446 = vector.extract_strided_slice %444 {offsets = [0, 0], sizes = [8, 64], strides = [1, 1]} : vector<8x96xf32> to vector<8x64xf32>
    %447 = arith.addf %445, %446 : vector<8x64xf32>
    %448 = arith.negf %447 : vector<8x64xf32>
    %449 = math.exp %448 : vector<8x64xf32>
    %cst_169 = arith.constant 1.000000e+00 : f32
    %450 = vector.broadcast %cst_169 : f32 to vector<8x64xf32>
    %451 = arith.addf %450, %449 : vector<8x64xf32>
    %452 = arith.divf %450, %451 : vector<8x64xf32>
    %453 = vector.extract_strided_slice %452 {offsets = [0, 0], sizes = [8, 32], strides = [1, 1]} : vector<8x64xf32> to vector<8x32xf32>
    %454 = vector.extract_strided_slice %452 {offsets = [0, 32], sizes = [8, 32], strides = [1, 1]} : vector<8x64xf32> to vector<8x32xf32>
    %455 = vector.extract_strided_slice %440 {offsets = [0, 64], sizes = [8, 32], strides = [1, 1]} : vector<8x96xf32> to vector<8x32xf32>
    %456 = vector.extract_strided_slice %444 {offsets = [0, 64], sizes = [8, 32], strides = [1, 1]} : vector<8x96xf32> to vector<8x32xf32>
    %457 = arith.mulf %453, %456 : vector<8x32xf32>
    %458 = arith.addf %455, %457 : vector<8x32xf32>
    %459 = math.tanh %458 : vector<8x32xf32>
    %cst_170 = arith.constant 1.000000e+00 : f32
    %460 = vector.broadcast %cst_170 : f32 to vector<8x32xf32>
    %461 = arith.subf %460, %454 : vector<8x32xf32>
    %462 = arith.mulf %461, %459 : vector<8x32xf32>
    %463 = arith.mulf %454, %439 : vector<8x32xf32>
    %464 = arith.addf %462, %463 : vector<8x32xf32>
    %c40_171 = arith.constant 40 : index
    %c0_172 = arith.constant 0 : index
    %465 = vector.load %arg12[%c40_171, %c0_172] : memref<64x96xf32, #tpu.memory_space<vmem>>, vector<8x96xf32>
    %466 = tpu.concatenate %464, %464 in 1 : vector<8x32xf32>, vector<8x32xf32> -> vector<8x64xf32>
    %467 = arith.mulf %466, %10 : vector<8x64xf32>
    %cst_173 = arith.constant dense<0.000000e+00> : vector<8x96xf32>
    %468 = tpu.matmul %467, %293, %cst_173 {dimension_numbers = #tpu.dot_dimension_numbers<[1], [0], [0], [1], [0, 0, 1, 1], [], []>} : vector<8x64xf32>, vector<64x96xf32>, vector<8x96xf32> -> vector<8x96xf32>
    %469 = arith.addf %468, %302 : vector<8x96xf32>
    %470 = vector.extract_strided_slice %465 {offsets = [0, 0], sizes = [8, 64], strides = [1, 1]} : vector<8x96xf32> to vector<8x64xf32>
    %471 = vector.extract_strided_slice %469 {offsets = [0, 0], sizes = [8, 64], strides = [1, 1]} : vector<8x96xf32> to vector<8x64xf32>
    %472 = arith.addf %470, %471 : vector<8x64xf32>
    %473 = arith.negf %472 : vector<8x64xf32>
    %474 = math.exp %473 : vector<8x64xf32>
    %cst_174 = arith.constant 1.000000e+00 : f32
    %475 = vector.broadcast %cst_174 : f32 to vector<8x64xf32>
    %476 = arith.addf %475, %474 : vector<8x64xf32>
    %477 = arith.divf %475, %476 : vector<8x64xf32>
    %478 = vector.extract_strided_slice %477 {offsets = [0, 0], sizes = [8, 32], strides = [1, 1]} : vector<8x64xf32> to vector<8x32xf32>
    %479 = vector.extract_strided_slice %477 {offsets = [0, 32], sizes = [8, 32], strides = [1, 1]} : vector<8x64xf32> to vector<8x32xf32>
    %480 = vector.extract_strided_slice %465 {offsets = [0, 64], sizes = [8, 32], strides = [1, 1]} : vector<8x96xf32> to vector<8x32xf32>
    %481 = vector.extract_strided_slice %469 {offsets = [0, 64], sizes = [8, 32], strides = [1, 1]} : vector<8x96xf32> to vector<8x32xf32>
    %482 = arith.mulf %478, %481 : vector<8x32xf32>
    %483 = arith.addf %480, %482 : vector<8x32xf32>
    %484 = math.tanh %483 : vector<8x32xf32>
    %cst_175 = arith.constant 1.000000e+00 : f32
    %485 = vector.broadcast %cst_175 : f32 to vector<8x32xf32>
    %486 = arith.subf %485, %479 : vector<8x32xf32>
    %487 = arith.mulf %486, %484 : vector<8x32xf32>
    %488 = arith.mulf %479, %464 : vector<8x32xf32>
    %489 = arith.addf %487, %488 : vector<8x32xf32>
    %c48_176 = arith.constant 48 : index
    %c0_177 = arith.constant 0 : index
    %490 = vector.load %arg12[%c48_176, %c0_177] : memref<64x96xf32, #tpu.memory_space<vmem>>, vector<8x96xf32>
    %491 = tpu.concatenate %489, %489 in 1 : vector<8x32xf32>, vector<8x32xf32> -> vector<8x64xf32>
    %492 = arith.mulf %491, %10 : vector<8x64xf32>
    %cst_178 = arith.constant dense<0.000000e+00> : vector<8x96xf32>
    %493 = tpu.matmul %492, %293, %cst_178 {dimension_numbers = #tpu.dot_dimension_numbers<[1], [0], [0], [1], [0, 0, 1, 1], [], []>} : vector<8x64xf32>, vector<64x96xf32>, vector<8x96xf32> -> vector<8x96xf32>
    %494 = arith.addf %493, %302 : vector<8x96xf32>
    %495 = vector.extract_strided_slice %490 {offsets = [0, 0], sizes = [8, 64], strides = [1, 1]} : vector<8x96xf32> to vector<8x64xf32>
    %496 = vector.extract_strided_slice %494 {offsets = [0, 0], sizes = [8, 64], strides = [1, 1]} : vector<8x96xf32> to vector<8x64xf32>
    %497 = arith.addf %495, %496 : vector<8x64xf32>
    %498 = arith.negf %497 : vector<8x64xf32>
    %499 = math.exp %498 : vector<8x64xf32>
    %cst_179 = arith.constant 1.000000e+00 : f32
    %500 = vector.broadcast %cst_179 : f32 to vector<8x64xf32>
    %501 = arith.addf %500, %499 : vector<8x64xf32>
    %502 = arith.divf %500, %501 : vector<8x64xf32>
    %503 = vector.extract_strided_slice %502 {offsets = [0, 0], sizes = [8, 32], strides = [1, 1]} : vector<8x64xf32> to vector<8x32xf32>
    %504 = vector.extract_strided_slice %502 {offsets = [0, 32], sizes = [8, 32], strides = [1, 1]} : vector<8x64xf32> to vector<8x32xf32>
    %505 = vector.extract_strided_slice %490 {offsets = [0, 64], sizes = [8, 32], strides = [1, 1]} : vector<8x96xf32> to vector<8x32xf32>
    %506 = vector.extract_strided_slice %494 {offsets = [0, 64], sizes = [8, 32], strides = [1, 1]} : vector<8x96xf32> to vector<8x32xf32>
    %507 = arith.mulf %503, %506 : vector<8x32xf32>
    %508 = arith.addf %505, %507 : vector<8x32xf32>
    %509 = math.tanh %508 : vector<8x32xf32>
    %cst_180 = arith.constant 1.000000e+00 : f32
    %510 = vector.broadcast %cst_180 : f32 to vector<8x32xf32>
    %511 = arith.subf %510, %504 : vector<8x32xf32>
    %512 = arith.mulf %511, %509 : vector<8x32xf32>
    %513 = arith.mulf %504, %489 : vector<8x32xf32>
    %514 = arith.addf %512, %513 : vector<8x32xf32>
    %c56_181 = arith.constant 56 : index
    %c0_182 = arith.constant 0 : index
    %515 = vector.load %arg12[%c56_181, %c0_182] : memref<64x96xf32, #tpu.memory_space<vmem>>, vector<8x96xf32>
    %516 = tpu.concatenate %514, %514 in 1 : vector<8x32xf32>, vector<8x32xf32> -> vector<8x64xf32>
    %517 = arith.mulf %516, %10 : vector<8x64xf32>
    %cst_183 = arith.constant dense<0.000000e+00> : vector<8x96xf32>
    %518 = tpu.matmul %517, %293, %cst_183 {dimension_numbers = #tpu.dot_dimension_numbers<[1], [0], [0], [1], [0, 0, 1, 1], [], []>} : vector<8x64xf32>, vector<64x96xf32>, vector<8x96xf32> -> vector<8x96xf32>
    %519 = arith.addf %518, %302 : vector<8x96xf32>
    %520 = vector.extract_strided_slice %515 {offsets = [0, 0], sizes = [8, 64], strides = [1, 1]} : vector<8x96xf32> to vector<8x64xf32>
    %521 = vector.extract_strided_slice %519 {offsets = [0, 0], sizes = [8, 64], strides = [1, 1]} : vector<8x96xf32> to vector<8x64xf32>
    %522 = arith.addf %520, %521 : vector<8x64xf32>
    %523 = arith.negf %522 : vector<8x64xf32>
    %524 = math.exp %523 : vector<8x64xf32>
    %cst_184 = arith.constant 1.000000e+00 : f32
    %525 = vector.broadcast %cst_184 : f32 to vector<8x64xf32>
    %526 = arith.addf %525, %524 : vector<8x64xf32>
    %527 = arith.divf %525, %526 : vector<8x64xf32>
    %528 = vector.extract_strided_slice %527 {offsets = [0, 0], sizes = [8, 32], strides = [1, 1]} : vector<8x64xf32> to vector<8x32xf32>
    %529 = vector.extract_strided_slice %527 {offsets = [0, 32], sizes = [8, 32], strides = [1, 1]} : vector<8x64xf32> to vector<8x32xf32>
    %530 = vector.extract_strided_slice %515 {offsets = [0, 64], sizes = [8, 32], strides = [1, 1]} : vector<8x96xf32> to vector<8x32xf32>
    %531 = vector.extract_strided_slice %519 {offsets = [0, 64], sizes = [8, 32], strides = [1, 1]} : vector<8x96xf32> to vector<8x32xf32>
    %532 = arith.mulf %528, %531 : vector<8x32xf32>
    %533 = arith.addf %530, %532 : vector<8x32xf32>
    %534 = math.tanh %533 : vector<8x32xf32>
    %cst_185 = arith.constant 1.000000e+00 : f32
    %535 = vector.broadcast %cst_185 : f32 to vector<8x32xf32>
    %536 = arith.subf %535, %529 : vector<8x32xf32>
    %537 = arith.mulf %536, %534 : vector<8x32xf32>
    %538 = arith.mulf %529, %514 : vector<8x32xf32>
    %539 = arith.addf %537, %538 : vector<8x32xf32>
    %540 = vector.extract_strided_slice %539 {offsets = [0, 0], sizes = [4, 32], strides = [1, 1]} : vector<8x32xf32> to vector<4x32xf32>
    %541 = tpu.concatenate %540, %364 in 1 : vector<4x32xf32>, vector<4x32xf32> -> vector<4x64xf32>
    %c0_186 = arith.constant 0 : index
    %c0_187 = arith.constant 0 : index
    %542 = vector.load %arg9[%c0_186, %c0_187] : memref<64x6xf32, #tpu.memory_space<vmem>>, vector<64x6xf32>
    %cst_188 = arith.constant dense<0.000000e+00> : vector<4x6xf32>
    %543 = tpu.matmul %541, %542, %cst_188 {dimension_numbers = #tpu.dot_dimension_numbers<[1], [0], [0], [1], [0, 0, 1, 1], [], []>} : vector<4x64xf32>, vector<64x6xf32>, vector<4x6xf32> -> vector<4x6xf32>
    %c0_189 = arith.constant 0 : index
    %c0_190 = arith.constant 0 : index
    %544 = vector.load %arg10[%c0_189, %c0_190] : memref<1x6xf32, #tpu.memory_space<vmem>>, vector<1x6xf32>
    %545 = vector.broadcast %544 : vector<1x6xf32> to vector<4x6xf32>
    %546 = arith.addf %543, %545 : vector<4x6xf32>
    %c0_191 = arith.constant 0 : index
    %c0_192 = arith.constant 0 : index
    %547 = vector.load %arg11[%c0_191, %c0_192] : memref<4x6xf32, #tpu.memory_space<vmem>>, vector<4x6xf32>
    tpu.vector_store %arg11[%c0_191, %c0_192], %546 {strides = array<i32>} : memref<4x6xf32, #tpu.memory_space<vmem>>, vector<4x6xf32>,
    return
  }
}

</mosaic_0001>

<bundles_post_ra>
// kernel: bigru_forward.1
= control target key start
LH: loop header
LB: loop body
LE: loop exit
PB: predicated region body
PF: predicated region fallthrough
CT: control target
= control target key end

     0   :  { %v38_v0 = vlaneseq  ;;  %vm99_vm0 = vcmask 1040384   ;;  %vm3100_vm1 = vmmov 1   ;;  %v3101_v4 = vmov 0.0   ;;  %s3105_s29 = smov 64   ;;  %s3106_s30 = smov 96   ;;  %s3832_s1 = inlined_call_operand.vmem [shape: f32[9,192], index: 1, kind: input, shape index: {}]   ;;  %s3833_s2 = inlined_call_operand.vmem [shape: f32[64,96], index: 2, kind: input, shape index: {}]   ;;  %s3834_s0 = inlined_call_operand.vmem [shape: f32[32,9], index: 0, kind: input, shape index: {}]   ;;  %s3835_s3 = inlined_call_operand.vmem [shape: f32[1,192], index: 3, kind: input, shape index: {}]   ;;  %s3836_s4 = inlined_call_operand.vmem [shape: f32[2,96], index: 4, kind: input, shape index: {}]   ;;  %s3837_s5 = inlined_call_operand.vmem [shape: f32[64,192], index: 5, kind: input, shape index: {}]   ;;  %s3838_s6 = inlined_call_operand.vmem [shape: f32[64,96], index: 6, kind: input, shape index: {}]   ;;  %s3839_s7 = inlined_call_operand.vmem [shape: f32[1,192], index: 7, kind: input, shape index: {}]   ;;  %s3840_s8 = inlined_call_operand.vmem [shape: f32[2,96], index: 8, kind: input, shape index: {}]   ;;  %s3841_s9 = inlined_call_operand.vmem [shape: f32[64,6], index: 9, kind: input, shape index: {}]   ;;  %s3842_s10 = inlined_call_operand.vmem [shape: f32[1,6], index: 10, kind: input, shape index: {}]   ;;  %s3843_s11 = inlined_call_operand.vmem [shape: f32[4,6], index: 11, kind: output, shape index: {}]  }
   0x1   :  { %v52_v1 = vld [vmem:[%s3832_s1 + $0x8] sm:$0xff]  ;;  %v54_v2 = vld [vmem:[%s3832_s1 + $0x18] sm:$0x1]  ;;  %vm3174_vm2 = vmpackc.low %vm99_vm0, %vm3100_vm1  ;;  %170 = vmatprep.mubr.f32.mxu0 %v3101_v4  ;;  %v3102_v10 = vmov 0.0|0.0   ;;  %vm3103_vm3 = vmmov 0   ;;  %vm86_vm4 = vcmask 72704  }
   0x2   :  { %v3179_v5 = vshrl.u32 %v38_v0, 7  ;;  %v41_v6 = vand.u32 127, %v38_v0  ;;  %v2771_v7 = vpack.c.bf16 %v54_v2, %v52_v1  ;;  %v51_v8 = vld [vmem:[%s3832_s1] sm:$0xff]  ;;  %v53_v9 = vld [vmem:[%s3832_s1 + $0x10] sm:$0x1]  ;;  %2777 = vmatprep.subr.bf16.mxu1 %v3102_v10  ;;  %2464 = vmatprep.mubr.msk.f32.mxu1 %vm3103_vm3, %v3101_v4  ;;  %v56_v13 = vld [vmem:[%s3833_s2 + $0x8] sm:$0xff] }
   0x3   :  { %v2774_v11 = vpack.c.bf16 %v53_v9, %v51_v8  ;;  %v55_v12 = vld [vmem:[%s3833_s2] sm:$0xff]  ;;  %v57_v16 = vld [vmem:[%s3833_s2 + $0x10] sm:$0xff]  ;;  %v58_v17 = vld [vmem:[%s3833_s2 + $0x18] sm:$0xff]  ;;  %vm248_vm9 = vcmask 523264   ;;  %vm195_vm10 = vcmask 781312   ;;  %vm206_vm11 = vcmask 785412  }
   0x4   :  { %2773 = vmatprep.subr.msk.bf16.mxu0 %vm3174_vm2, %v2771_v7  ;;  %v47_v14 = vld [vmem:[%s3834_s0] sm:$0xff]  ;;  %v3203_v15 = vpack.c.bf16 %v56_v13, %v55_v12  ;;  %vm42_vm5 = vcmp.lt.s32.totalorder %v3179_v5, 4  ;;  %vm43_vm6 = vcmp.lt.s32.totalorder %v41_v6, 32  ;;  %v3214_v18 = vpack.c.bf16 %v58_v17, %v57_v16  ;;  %v60_v20 = vld [vmem:[%s3833_s2 + $0x28] sm:$0xff]  ;;  %v61_v23 = vld [vmem:[%s3833_s2 + $0x30] sm:$0xff] }
   0x5   :  { %2776 = vmatpush1.bf16.msk.msra.mxu0 %vm3174_vm2, %v2774_v11  ;;  %v59_v19 = vld [vmem:[%s3833_s2 + $0x20] sm:$0xff]  ;;  %vm44_vm7 = vmxor %vm42_vm5, %vm43_vm6  ;;  %v48_v21 = vld [vmem:[%s3834_s0 + $0x8] sm:$0xff]  ;;  %v3285_v30 = vsub.s32 0, %v3179_v5  ;;  %v3288_v31 = vsub.s32 1, %v3179_v5  ;;  %vm73_vm12 = vcmask 1043456   ;;  %vm203_vm13 = vcmask 261120  }
   0x6   :  { %2789 = vmatprep.subr.bf16.mxu0 %v3102_v10  ;;  %2779 = vmatpush3.bf16.msra.mxu1 %v3203_v15  ;;  %v3231_v22 = vpack.c.bf16 %v60_v20, %v59_v19  ;;  %vm45_vm8 = vmxor %vm44_vm7, %vm3100_vm1  ;;  %v62_v24 = vld [vmem:[%s3833_s2 + $0x38] sm:$0xff]  ;;  %v49_v25 = vld [vmem:[%s3834_s0 + $0x10] sm:$0xff]  ;;  %vm354_vm14 = vcmask 523524   ;;  %vm352_vm15 = vcmask 257024   ;;  %vm2245_vm0 = vcmask 44032  }
   0x7   :  { %2780 = vmatprep.subr.bf16.mxu1 %v3102_v10  ;;  %v3249_v26 = vsel %vm45_vm8, 1.0, %v3101_v4  ;;  %v3252_v27 = vpack.c.bf16 %v62_v24, %v61_v23  ;;  %v50_v28 = vld [vmem:[%s3834_s0 + $0x18] sm:$0xff]  ;;  %v63_v32 = vld [vmem:[%s3835_s3] sm:$0x3] }
   0x8   :  { %2253 = vmatmul.mubr.msk.f32.vlgmr.msra.gmra.mrb[0].mxu0 %vm86_vm4, %v47_v14  ;;  %v3262_v29 = vmul.f32 0.0, %v3249_v26  ;;  %v79_v33 = vrot.slane %v63_v32, %v3285_v30  ;;  %v83_v34 = vrot.slane %v63_v32, %v3288_v31  ;;  %v64_v42 = vld [vmem:[%s3836_s4] sm:$0x3]  ;;  %s3104_s4 = smov 32  }
   0x9   :  { %176 = vmatprep.mubr.f32.mxu0 %v3101_v4  ;;  %2791 = vmatpush3.bf16.msra.mxu0 %v3203_v15  ;;  %v68_v45 = vrot.slane %v64_v42, %v3285_v30  ;;  %v72_v46 = vrot.slane %v64_v42, %v3288_v31 }
   0xa   :  { %2792 = vmatprep.subr.bf16.mxu0 %v3102_v10  ;;  %2782 = vmatpush3.bf16.msra.mxu1 %v3214_v18 }
   0xb   :  { %2783 = vmatprep.subr.bf16.mxu1 %v3102_v10  ;;  %v3325_v51 = vsel %vm73_vm12, %v68_v45, %v72_v46 }
   0xc   :  { %2254 = vmatmul.mubr.msk.f32.gmra.mrb[2].mxu0 %vm86_vm4, %v48_v21 }
   0xd   :  { %182 = vmatprep.mubr.f32.mxu0 %v3101_v4  ;;  %2794 = vmatpush3.bf16.msra.mxu0 %v3214_v18 }
   0xe   :  { %2795 = vmatprep.subr.bf16.mxu0 %v3102_v10  ;;  %2785 = vmatpush3.bf16.msra.mxu1 %v3231_v22 }
   0xf   :  { %2786 = vmatprep.subr.bf16.mxu1 %v3102_v10 }
  0x10   :  { %2255 = vmatmul.mubr.msk.f32.gmra.mrb[4].mxu0 %vm86_vm4, %v49_v25 }
  0x11   :  { %188 = vmatprep.mubr.f32.mxu0 %v3101_v4  ;;  %2797 = vmatpush3.bf16.msra.mxu0 %v3231_v22 }
  0x12   :  { %2798 = vmatprep.subr.bf16.mxu0 %v3102_v10  ;;  %2788 = vmatpush3.bf16.msra.mxu1 %v3252_v27 }
  0x13   :  { %2801 = vmatprep.subr.bf16.mxu1 %v3102_v10 }
  0x14   :  { %2256 = vmatmul.mubr.msk.f32.gmra.mrb[6].mxu0 %vm86_vm4, %v50_v28 }
  0x15   :  { %2800 = vmatpush3.bf16.msra.mxu0 %v3252_v27  ;;  %2483 = vmatprep.mubr.msk.f32.mxu0 %vm3103_vm3, %v3101_v4 }
  0x16   :  { %2465 = vmatmul.mubr.msk.f32.vlgmr.msra.gmra.mrb[0].mxu1 %vm248_vm9, %v3262_v29  ;;  %2813 = vmatprep.subr.bf16.mxu0 %v3102_v10 }
  0x17   :  { %2803 = vmatpush3.bf16.msra.mxu1 %v3203_v15  ;;  %2502 = vmatprep.mubr.msk.f32.mxu1 %vm3103_vm3, %v3101_v4 }
  0x18   :  { %2804 = vmatprep.subr.bf16.mxu1 %v3102_v10 }
  0x1b   :  { %2806 = vmatpush3.bf16.msra.mxu1 %v3214_v18 }
  0x1c   :  { %2807 = vmatprep.subr.bf16.mxu1 %v3102_v10 }
  0x1f   :  { %2809 = vmatpush3.bf16.msra.mxu1 %v3231_v22 }
  0x20   :  { %2810 = vmatprep.subr.bf16.mxu1 %v3102_v10 }
  0x23   :  { %2812 = vmatpush3.bf16.msra.mxu1 %v3252_v27 }
  0x24   :  { %2825 = vmatprep.subr.bf16.mxu1 %v3102_v10 }
  0xdb   :  { %v172_v35 = vpop.f32.mrb[0].mxu0 }
  0xdc   :  { %v3295_v36 = vadd.f32 %v172_v35, %v79_v33  ;;  %v174_v37 = vpop.f32.mrb[1].mxu0 }
  0xdd   :  { %v3297_v38 = vadd.f32 %v174_v37, %v83_v34 }
  0xde   :  { %196 = vst.msk [vmem:[#allocation2] sm:$0xf] %vm195_vm10, %v3295_v36 }
  0xdf   :  { %208 = vst.msk [vmem:[#allocation2 + $0x4] sm:$0xf0] %vm206_vm11, %v3295_v36  ;;  %v178_v39 = vpop.f32.mrb[2].mxu0 }
  0xe0   :  { %v3303_v40 = vadd.f32 %v178_v39, %v79_v33  ;;  %v180_v41 = vpop.f32.mrb[3].mxu0 }
  0xe1   :  { %v3308_v43 = vadd.f32 %v180_v41, %v83_v34 }
  0xe2   :  { %210 = vst.msk [vmem:[#allocation2 + $0x10] sm:$0xf] %vm195_vm10, %v3303_v40 }
  0xe3   :  { %220 = vst.msk [vmem:[#allocation2 + $0x14] sm:$0xf0] %vm206_vm11, %v3303_v40  ;;  %v184_v44 = vpop.f32.mrb[4].mxu0 }
  0xe4   :  { %v3316_v47 = vadd.f32 %v184_v44, %v79_v33  ;;  %v186_v48 = vpop.f32.mrb[5].mxu0 }
  0xe5   :  { %v3318_v49 = vadd.f32 %v186_v48, %v83_v34 }
  0xe6   :  { %222 = vst.msk [vmem:[#allocation2 + $0x20] sm:$0xf] %vm195_vm10, %v3316_v47 }
  0xe7   :  { %232 = vst.msk [vmem:[#allocation2 + $0x24] sm:$0xf0] %vm206_vm11, %v3316_v47  ;;  %v190_v50 = vpop.f32.mrb[6].mxu0 }
  0xe8   :  { %v191_v52 = vadd.f32 %v190_v50, %v79_v33  ;;  %v192_v53 = vpop.f32.mrb[7].mxu0 }
  0xe9   :  { %v318_v54 = vpop.f32.mrb[0].mxu1  ;;  %v193_v57 = vadd.f32 %v192_v53, %v83_v34 }
  0xea   :  { %234 = vst.msk [vmem:[#allocation2 + $0x30] sm:$0xf] %vm195_vm10, %v191_v52  ;;  %199 = vrot.lane.b32.xlu0 %v191_v52, %s3104_s4  ;;  %v319_v55 = vadd.f32 %v318_v54, %v3325_v51  ;;  %v2466_v56 = vpop.f32.mrb[1].mxu1 }
  0xeb   :  { %244 = vst.msk [vmem:[#allocation2 + $0x34] sm:$0xf0] %vm206_vm11, %v191_v52 }
  0xec   :  { %330 = vrot.lane.b32.xlu1 %v319_v55, %s3105_s29 }
  0xee   :  { %201 = vrot.lane.b32.xlu0 %v193_v57, %s3104_s4 }
 0x15c   :  { %v200_v58 = vpop.permute.xlu0 %199 }
 0x15e   :  { %v331_v2 = vpop.permute.xlu1 %330 }
 0x160   :  { %v202_v59 = vpop.permute.xlu0 %201 }
 0x161   :  { %v204_v60 = vsel %vm203_vm13, %v200_v58, %v202_v59 }
 0x162   :  { %207 = vst.msk [vmem:[#allocation2] sm:$0xf0] %vm206_vm11, %v204_v60 }
 0x163   :  { %209 = vst.msk [vmem:[#allocation2 + $0xc] sm:$0xf] %vm195_vm10, %v204_v60 }
 0x169   :  { %v246_v61 = vld [vmem:[#allocation2] sm:$0xff] }
 0x16a   :  { %v322_v62 = vadd.f32 %v319_v55, %v246_v61  ;;  %v356_v24 = vld [vmem:[#allocation2 + $0x8] sm:$0xff] }
 0x16c   :  { %v2258_v63 = vmul.f32 -1.442695, %v322_v62 }
 0x16e   :  { %3004 = vpow2.f32 %v2258_v63 }
 0x178   :  { %v3005_v0 = vpop.eup %3004 }
 0x179   :  { %v326_v1 = vadd.f32 1.0, %v3005_v0 }
 0x17b   :  { %3006 = vrcp.f32 %v326_v1 }
 0x185   :  { %v3007_v3 = vpop.eup %3006 }
 0x186   :  { %v333_v5 = vmul.f32 %v3007_v3, %v331_v2  ;;  %v340_v9 = vsub.f32 1.0, %v3007_v3  ;;  %v346_v12 = vmul.f32 0.0, %v3007_v3 }
 0x188   :  { %335 = vrot.lane.b32.xlu1 %v333_v5, %s3105_s29 }
 0x1fa   :  { %v336_v6 = vpop.permute.xlu1 %335 }
 0x1fb   :  { %v338_v7 = vadd.f32 %v336_v6, %v246_v61 }
 0x1fd   :  { %3008 = vtanh.f32 %v338_v7 }
 0x207   :  { %v3009_v8 = vpop.eup %3008 }
 0x208   :  { %342 = vrot.lane.b32.xlu0 %v3009_v8, %s3106_s30 }
 0x27a   :  { %v343_v11 = vpop.permute.xlu0 %342 }
 0x27b   :  { %v345_v13 = vmul.f32 %v343_v11, %v340_v9 }
 0x27d   :  { %v347_v14 = vadd.f32 %v346_v12, %v345_v13 }
 0x27f   :  { %349 = vrot.lane.b32.xlu1 %v347_v14, %s3106_s30  ;;  %355 = vst.msk [vmem:[#allocation3 + $0x18] sm:$0xf0] %vm354_vm14, %v347_v14 }
 0x2f1   :  { %v350_v16 = vpop.permute.xlu1 %349 }
 0x2f2   :  { %353 = vst.msk [vmem:[#allocation3] sm:$0xf] %vm352_vm15, %v350_v16  ;;  %v357_v17 = vsel %vm203_vm13, %v350_v16, %v347_v14 }
 0x2f3   :  { %v358_v19 = vmul.f32 %v357_v17, %v3249_v26 }
 0x2f5   :  { %2484 = vmatmul.mubr.msk.f32.vlgmr.msra.gmra.mrb[8].mxu0 %vm248_vm9, %v358_v19 }
 0x2f6   :  { %2815 = vmatpush3.bf16.msra.mxu0 %v3203_v15  ;;  %2521 = vmatprep.mubr.msk.f32.mxu0 %vm3103_vm3, %v3101_v4 }
 0x2f7   :  { %2816 = vmatprep.subr.bf16.mxu0 %v3102_v10 }
 0x2fa   :  { %2818 = vmatpush3.bf16.msra.mxu0 %v3214_v18 }
 0x2fb   :  { %2819 = vmatprep.subr.bf16.mxu0 %v3102_v10 }
 0x2fe   :  { %2821 = vmatpush3.bf16.msra.mxu0 %v3231_v22 }
 0x2ff   :  { %2822 = vmatprep.subr.bf16.mxu0 %v3102_v10 }
 0x302   :  { %2824 = vmatpush3.bf16.msra.mxu0 %v3252_v27 }
 0x303   :  { %2837 = vmatprep.subr.bf16.mxu0 %v3102_v10 }
 0x3c8   :  { %v428_v20 = vpop.f32.mrb[8].mxu0 }
 0x3c9   :  { %v429_v21 = vadd.f32 %v428_v20, %v3325_v51  ;;  %v2485_v23 = vpop.f32.mrb[9].mxu0 }
 0x3cb   :  { %440 = vrot.lane.b32.xlu0 %v429_v21, %s3105_s29  ;;  %v432_v25 = vadd.f32 %v429_v21, %v356_v24 }
 0x3cd   :  { %v2260_v28 = vmul.f32 -1.442695, %v432_v25 }
 0x3cf   :  { %3010 = vpow2.f32 %v2260_v28 }
 0x3d9   :  { %v3011_v32 = vpop.eup %3010 }
 0x3da   :  { %v436_v33 = vadd.f32 1.0, %v3011_v32 }
 0x3dc   :  { %3012 = vrcp.f32 %v436_v33 }
 0x3e6   :  { %v3013_v34 = vpop.eup %3012 }
 0x3e7   :  { %v450_v44 = vsub.f32 1.0, %v3013_v34  ;;  %v456_v46 = vmul.f32 %v3013_v34, %v347_v14 }
 0x43d   :  { %v441_v35 = vpop.permute.xlu0 %440 }
 0x43e   :  { %v443_v37 = vmul.f32 %v3013_v34, %v441_v35 }
 0x440   :  { %445 = vrot.lane.b32.xlu1 %v443_v37, %s3105_s29 }
 0x4b2   :  { %v446_v39 = vpop.permute.xlu1 %445 }
 0x4b3   :  { %v448_v41 = vadd.f32 %v446_v39, %v356_v24 }
 0x4b5   :  { %3014 = vtanh.f32 %v448_v41 }
 0x4bf   :  { %v3015_v42 = vpop.eup %3014 }
 0x4c0   :  { %452 = vrot.lane.b32.xlu0 %v3015_v42, %s3106_s30 }
 0x4c4   :  { %213 = vrot.lane.b32.xlu0 %v3316_v47, %s3104_s4 }
 0x532   :  { %v453_v45 = vpop.permute.xlu0 %452 }
 0x533   :  { %v455_v48 = vmul.f32 %v453_v45, %v450_v44 }
 0x535   :  { %v457_v50 = vadd.f32 %v456_v46, %v455_v48 }
 0x536   :  { %v214_v47 = vpop.permute.xlu0 %213 }
 0x537   :  { %459 = vrot.lane.b32.xlu1 %v457_v50, %s3106_s30  ;;  %463 = vst.msk [vmem:[#allocation3 + $0x14] sm:$0xf0] %vm354_vm14, %v457_v50 }
 0x53b   :  { %215 = vrot.lane.b32.xlu1 %v3318_v49, %s3104_s4 }
 0x5a9   :  { %v460_v52 = vpop.permute.xlu1 %459 }
 0x5aa   :  { %462 = vst.msk [vmem:[#allocation3 + $0x4] sm:$0xf] %vm352_vm15, %v460_v52  ;;  %v465_v53 = vsel %vm203_vm13, %v460_v52, %v457_v50 }
 0x5ab   :  { %v466_v54 = vmul.f32 %v465_v53, %v3249_v26 }
 0x5ad   :  { %2503 = vmatmul.mubr.msk.f32.vlgmr.msra.gmra.mrb[2].mxu1 %vm248_vm9, %v466_v54  ;;  %v216_v55 = vpop.permute.xlu1 %215 }
 0x5ae   :  { %v217_v56 = vsel %vm203_vm13, %v214_v47, %v216_v55  ;;  %2827 = vmatpush3.bf16.msra.mxu1 %v3203_v15  ;;  %2540 = vmatprep.mubr.msk.f32.mxu1 %vm3103_vm3, %v3101_v4 }
 0x5af   :  { %219 = vst.msk [vmem:[#allocation2 + $0x10] sm:$0xf0] %vm206_vm11, %v217_v56  ;;  %2828 = vmatprep.subr.bf16.mxu1 %v3102_v10 }
 0x5b0   :  { %221 = vst.msk [vmem:[#allocation2 + $0x1c] sm:$0xf] %vm195_vm10, %v217_v56 }
 0x5b2   :  { %2830 = vmatpush3.bf16.msra.mxu1 %v3214_v18 }
 0x5b3   :  { %2831 = vmatprep.subr.bf16.mxu1 %v3102_v10 }
 0x5b6   :  { %2833 = vmatpush3.bf16.msra.mxu1 %v3231_v22  ;;  %v464_v59 = vld [vmem:[#allocation2 + $0x10] sm:$0xff] }
 0x5b7   :  { %2834 = vmatprep.subr.bf16.mxu1 %v3102_v10  ;;  %v572_v21 = vld [vmem:[#allocation2 + $0x18] sm:$0xff] }
 0x5ba   :  { %2836 = vmatpush3.bf16.msra.mxu1 %v3252_v27 }
 0x5bb   :  { %2849 = vmatprep.subr.bf16.mxu1 %v3102_v10 }
 0x680   :  { %v536_v49 = vpop.f32.mrb[2].mxu1 }
 0x681   :  { %v537_v57 = vadd.f32 %v536_v49, %v3325_v51  ;;  %v2504_v58 = vpop.f32.mrb[3].mxu1 }
 0x683   :  { %548 = vrot.lane.b32.xlu0 %v537_v57, %s3105_s29  ;;  %v540_v60 = vadd.f32 %v537_v57, %v464_v59 }
 0x685   :  { %v2262_v61 = vmul.f32 -1.442695, %v540_v60 }
 0x687   :  { %3016 = vpow2.f32 %v2262_v61 }
 0x691   :  { %v3017_v62 = vpop.eup %3016 }
 0x692   :  { %v544_v63 = vadd.f32 1.0, %v3017_v62 }
 0x694   :  { %3018 = vrcp.f32 %v544_v63 }
 0x69e   :  { %v3019_v0 = vpop.eup %3018 }
 0x69f   :  { %v558_v7 = vsub.f32 1.0, %v3019_v0  ;;  %v564_v9 = vmul.f32 %v3019_v0, %v457_v50 }
 0x6f5   :  { %v549_v1 = vpop.permute.xlu0 %548 }
 0x6f6   :  { %v551_v2 = vmul.f32 %v3019_v0, %v549_v1 }
 0x6f8   :  { %553 = vrot.lane.b32.xlu1 %v551_v2, %s3105_s29 }
 0x76a   :  { %v554_v3 = vpop.permute.xlu1 %553 }
 0x76b   :  { %v556_v5 = vadd.f32 %v554_v3, %v464_v59 }
 0x76d   :  { %3020 = vtanh.f32 %v556_v5 }
 0x777   :  { %v3021_v6 = vpop.eup %3020 }
 0x778   :  { %560 = vrot.lane.b32.xlu0 %v3021_v6, %s3106_s30 }
 0x7ea   :  { %v561_v8 = vpop.permute.xlu0 %560 }
 0x7eb   :  { %v563_v11 = vmul.f32 %v561_v8, %v558_v7 }
 0x7ed   :  { %v565_v12 = vadd.f32 %v564_v9, %v563_v11 }
 0x7ef   :  { %567 = vrot.lane.b32.xlu1 %v565_v12, %s3106_s30  ;;  %571 = vst.msk [vmem:[#allocation3 + $0x10] sm:$0xf0] %vm354_vm14, %v565_v12 }
 0x861   :  { %v568_v13 = vpop.permute.xlu1 %567 }
 0x862   :  { %570 = vst.msk [vmem:[#allocation3 + $0x8] sm:$0xf] %vm352_vm15, %v568_v13  ;;  %v573_v14 = vsel %vm203_vm13, %v568_v13, %v565_v12 }
 0x863   :  { %v574_v16 = vmul.f32 %v573_v14, %v3249_v26 }
 0x865   :  { %2522 = vmatmul.mubr.msk.f32.vlgmr.msra.gmra.mrb[10].mxu0 %vm248_vm9, %v574_v16 }
 0x866   :  { %2839 = vmatpush3.bf16.msra.mxu0 %v3203_v15  ;;  %2559 = vmatprep.mubr.msk.f32.mxu0 %vm3103_vm3, %v3101_v4 }
 0x867   :  { %2840 = vmatprep.subr.bf16.mxu0 %v3102_v10 }
 0x86a   :  { %2842 = vmatpush3.bf16.msra.mxu0 %v3214_v18 }
 0x86b   :  { %2843 = vmatprep.subr.bf16.mxu0 %v3102_v10 }
 0x86e   :  { %2845 = vmatpush3.bf16.msra.mxu0 %v3231_v22 }
 0x86f   :  { %2846 = vmatprep.subr.bf16.mxu0 %v3102_v10 }
 0x872   :  { %2848 = vmatpush3.bf16.msra.mxu0 %v3252_v27 }
 0x873   :  { %2861 = vmatprep.subr.bf16.mxu0 %v3102_v10 }
 0x938   :  { %v644_v17 = vpop.f32.mrb[10].mxu0 }
 0x939   :  { %v645_v19 = vadd.f32 %v644_v17, %v3325_v51  ;;  %v2523_v20 = vpop.f32.mrb[11].mxu0 }
 0x93b   :  { %656 = vrot.lane.b32.xlu0 %v645_v19, %s3105_s29  ;;  %v648_v23 = vadd.f32 %v645_v19, %v572_v21 }
 0x93d   :  { %v2264_v24 = vmul.f32 -1.442695, %v648_v23 }
 0x93f   :  { %3022 = vpow2.f32 %v2264_v24 }
 0x949   :  { %v3023_v25 = vpop.eup %3022 }
 0x94a   :  { %v652_v28 = vadd.f32 1.0, %v3023_v25 }
 0x94c   :  { %3024 = vrcp.f32 %v652_v28 }
 0x956   :  { %v3025_v32 = vpop.eup %3024 }
 0x957   :  { %v666_v41 = vsub.f32 1.0, %v3025_v32  ;;  %v672_v44 = vmul.f32 %v3025_v32, %v565_v12 }
 0x9ad   :  { %v657_v33 = vpop.permute.xlu0 %656 }
 0x9ae   :  { %v659_v34 = vmul.f32 %v3025_v32, %v657_v33 }
 0x9b0   :  { %661 = vrot.lane.b32.xlu1 %v659_v34, %s3105_s29 }
 0xa22   :  { %v662_v35 = vpop.permute.xlu1 %661 }
 0xa23   :  { %v664_v37 = vadd.f32 %v662_v35, %v572_v21 }
 0xa25   :  { %3026 = vtanh.f32 %v664_v37 }
 0xa2f   :  { %v3027_v39 = vpop.eup %3026 }
 0xa30   :  { %668 = vrot.lane.b32.xlu0 %v3027_v39, %s3106_s30 }
 0xa34   :  { %225 = vrot.lane.b32.xlu0 %v3303_v40, %s3104_s4 }
 0xaa2   :  { %v669_v42 = vpop.permute.xlu0 %668 }
 0xaa3   :  { %v671_v45 = vmul.f32 %v669_v42, %v666_v41 }
 0xaa5   :  { %v673_v46 = vadd.f32 %v672_v44, %v671_v45 }
 0xaa6   :  { %v226_v40 = vpop.permute.xlu0 %225 }
 0xaa7   :  { %675 = vrot.lane.b32.xlu1 %v673_v46, %s3106_s30  ;;  %679 = vst.msk [vmem:[#allocation3 + $0xc] sm:$0xf0] %vm354_vm14, %v673_v46 }
 0xaab   :  { %227 = vrot.lane.b32.xlu1 %v3308_v43, %s3104_s4 }
 0xb19   :  { %v676_v48 = vpop.permute.xlu1 %675 }
 0xb1a   :  { %678 = vst.msk [vmem:[#allocation3 + $0xc] sm:$0xf] %vm352_vm15, %v676_v48  ;;  %v681_v50 = vsel %vm203_vm13, %v676_v48, %v673_v46 }
 0xb1b   :  { %v682_v52 = vmul.f32 %v681_v50, %v3249_v26 }
 0xb1d   :  { %2541 = vmatmul.mubr.msk.f32.vlgmr.msra.gmra.mrb[4].mxu1 %vm248_vm9, %v682_v52  ;;  %v228_v53 = vpop.permute.xlu1 %227 }
 0xb1e   :  { %v229_v54 = vsel %vm203_vm13, %v226_v40, %v228_v53  ;;  %2851 = vmatpush3.bf16.msra.mxu1 %v3203_v15  ;;  %2578 = vmatprep.mubr.msk.f32.mxu1 %vm3103_vm3, %v3101_v4 }
 0xb1f   :  { %231 = vst.msk [vmem:[#allocation2 + $0x20] sm:$0xf0] %vm206_vm11, %v229_v54  ;;  %2852 = vmatprep.subr.bf16.mxu1 %v3102_v10 }
 0xb20   :  { %233 = vst.msk [vmem:[#allocation2 + $0x2c] sm:$0xf] %vm195_vm10, %v229_v54 }
 0xb22   :  { %2854 = vmatpush3.bf16.msra.mxu1 %v3214_v18 }
 0xb23   :  { %2855 = vmatprep.subr.bf16.mxu1 %v3102_v10 }
 0xb26   :  { %2857 = vmatpush3.bf16.msra.mxu1 %v3231_v22  ;;  %v680_v56 = vld [vmem:[#allocation2 + $0x20] sm:$0xff] }
 0xb27   :  { %2858 = vmatprep.subr.bf16.mxu1 %v3102_v10  ;;  %v788_v14 = vld [vmem:[#allocation2 + $0x28] sm:$0xff] }
 0xb2a   :  { %2860 = vmatpush3.bf16.msra.mxu1 %v3252_v27 }
 0xbf0   :  { %v752_v43 = vpop.f32.mrb[4].mxu1 }
 0xbf1   :  { %v753_v47 = vadd.f32 %v752_v43, %v3325_v51  ;;  %v2542_v55 = vpop.f32.mrb[5].mxu1 }
 0xbf3   :  { %764 = vrot.lane.b32.xlu0 %v753_v47, %s3105_s29  ;;  %v756_v49 = vadd.f32 %v753_v47, %v680_v56 }
 0xbf5   :  { %v2266_v57 = vmul.f32 -1.442695, %v756_v49 }
 0xbf7   :  { %3028 = vpow2.f32 %v2266_v57 }
 0xc01   :  { %v3029_v58 = vpop.eup %3028 }
 0xc02   :  { %v760_v59 = vadd.f32 1.0, %v3029_v58 }
 0xc04   :  { %3030 = vrcp.f32 %v760_v59 }
 0xc0e   :  { %v3031_v60 = vpop.eup %3030 }
 0xc0f   :  { %v774_v2 = vsub.f32 1.0, %v3031_v60  ;;  %v780_v5 = vmul.f32 %v3031_v60, %v673_v46 }
 0xc65   :  { %v765_v61 = vpop.permute.xlu0 %764 }
 0xc66   :  { %v767_v62 = vmul.f32 %v3031_v60, %v765_v61 }
 0xc68   :  { %769 = vrot.lane.b32.xlu1 %v767_v62, %s3105_s29 }
 0xcda   :  { %v770_v63 = vpop.permute.xlu1 %769 }
 0xcdb   :  { %v772_v0 = vadd.f32 %v770_v63, %v680_v56 }
 0xcdd   :  { %3032 = vtanh.f32 %v772_v0 }
 0xce7   :  { %v3033_v1 = vpop.eup %3032 }
 0xce8   :  { %776 = vrot.lane.b32.xlu0 %v3033_v1, %s3106_s30 }
 0xd5a   :  { %v777_v3 = vpop.permute.xlu0 %776 }
 0xd5b   :  { %v779_v6 = vmul.f32 %v777_v3, %v774_v2 }
 0xd5d   :  { %v781_v7 = vadd.f32 %v780_v5, %v779_v6 }
 0xd5f   :  { %787 = vst.msk [vmem:[#allocation3 + $0x8] sm:$0xf0] %vm354_vm14, %v781_v7  ;;  %783 = vrot.lane.b32.xlu1 %v781_v7, %s3106_s30 }
 0xdd1   :  { %v784_v8 = vpop.permute.xlu1 %783 }
 0xdd2   :  { %786 = vst.msk [vmem:[#allocation3 + $0x10] sm:$0xf] %vm352_vm15, %v784_v8  ;;  %v789_v9 = vsel %vm203_vm13, %v784_v8, %v781_v7 }
 0xdd3   :  { %v790_v11 = vmul.f32 %v789_v9, %v3249_v26 }
 0xdd5   :  { %2560 = vmatmul.mubr.msk.f32.vlgmr.msra.gmra.mrb[12].mxu0 %vm248_vm9, %v790_v11 }
 0xdd6   :  { %2863 = vmatpush3.bf16.msra.mxu0 %v3203_v15  ;;  %2597 = vmatprep.mubr.msk.f32.mxu0 %vm3103_vm3, %v3101_v4 }
 0xdd7   :  { %2864 = vmatprep.subr.bf16.mxu0 %v3102_v10 }
 0xdda   :  { %2866 = vmatpush3.bf16.msra.mxu0 %v3214_v18 }
 0xddb   :  { %2867 = vmatprep.subr.bf16.mxu0 %v3102_v10 }
 0xdde   :  { %2869 = vmatpush3.bf16.msra.mxu0 %v3231_v22 }
 0xddf   :  { %2870 = vmatprep.subr.bf16.mxu0 %v3102_v10 }
 0xde2   :  { %2872 = vmatpush3.bf16.msra.mxu0 %v3252_v27 }
 0xde3   :  { %2889 = vmatprep.subr.bf16.mxu0 %v3102_v10 }
 0xea8   :  { %v860_v12 = vpop.f32.mrb[12].mxu0 }
 0xea9   :  { %v861_v15 = vadd.f32 %v860_v12, %v3325_v51  ;;  %v2561_v13 = vpop.f32.mrb[13].mxu0 }
 0xeaa   :  { %v1116_v13 = vld [vmem:[%s3837_s5] sm:$0xff] }
 0xeab   :  { %872 = vrot.lane.b32.xlu0 %v861_v15, %s3105_s29  ;;  %v864_v16 = vadd.f32 %v861_v15, %v788_v14  ;;  %v1117_v15 = vld [vmem:[%s3837_s5 + $0x8] sm:$0xff] }
 0xead   :  { %v2268_v17 = vmul.f32 -1.442695, %v864_v16  ;;  %v1118_v16 = vld [vmem:[%s3837_s5 + $0x10] sm:$0xff] }
 0xeaf   :  { %3034 = vpow2.f32 %v2268_v17  ;;  %v2875_v17 = vpack.c.bf16 %v1118_v16, %v1116_v13 }
 0xeb9   :  { %v3035_v18 = vpop.eup %3034 }
 0xeba   :  { %v868_v19 = vadd.f32 1.0, %v3035_v18  ;;  %v1121_v18 = vld [vmem:[%s3837_s5 + $0x28] sm:$0xff] }
 0xebc   :  { %3036 = vrcp.f32 %v868_v19  ;;  %v1123_v19 = vld [vmem:[%s3837_s5 + $0x38] sm:$0xff] }
 0xec6   :  { %v3037_v22 = vpop.eup %3036 }
 0xec7   :  { %v882_v25 = vsub.f32 1.0, %v3037_v22  ;;  %v888_v32 = vmul.f32 %v3037_v22, %v781_v7 }
 0xf1d   :  { %v873_v20 = vpop.permute.xlu0 %872 }
 0xf1e   :  { %v875_v21 = vmul.f32 %v3037_v22, %v873_v20  ;;  %v2877_v22 = vpack.c.bf16 %v1123_v19, %v1121_v18  ;;  %v1120_v20 = vld [vmem:[%s3837_s5 + $0x20] sm:$0xff] }
 0xf20   :  { %877 = vrot.lane.b32.xlu1 %v875_v21, %s3105_s29  ;;  %v1122_v21 = vld [vmem:[%s3837_s5 + $0x30] sm:$0xff] }
 0xf92   :  { %v878_v27 = vpop.permute.xlu1 %877 }
 0xf93   :  { %v880_v23 = vadd.f32 %v878_v27, %v788_v14 }
 0xf95   :  { %3038 = vtanh.f32 %v880_v23  ;;  %v2879_v23 = vpack.c.bf16 %v1122_v21, %v1120_v20 }
 0xf9f   :  { %v3039_v24 = vpop.eup %3038 }
 0xfa0   :  { %884 = vrot.lane.b32.xlu0 %v3039_v24, %s3106_s30 }
 0xfa4   :  { %237 = vrot.lane.b32.xlu0 %v3295_v36, %s3104_s4 }
0x1012   :  { %v885_v28 = vpop.permute.xlu0 %884 }
0x1013   :  { %v887_v33 = vmul.f32 %v885_v28, %v882_v25  ;;  %v1125_v25 = vld [vmem:[%s3837_s5 + $0x48] sm:$0xff]  ;;  %v1127_v28 = vld [vmem:[%s3837_s5 + $0x58] sm:$0xff] }
0x1015   :  { %v889_v34 = vadd.f32 %v888_v32, %v887_v33  ;;  %v2881_v32 = vpack.c.bf16 %v1127_v28, %v1125_v25  ;;  %v1124_v33 = vld [vmem:[%s3837_s5 + $0x40] sm:$0xff] }
0x1016   :  { %v238_v36 = vpop.permute.xlu0 %237 }
0x1017   :  { %895 = vst.msk [vmem:[#allocation3 + $0x4] sm:$0xf0] %vm354_vm14, %v889_v34  ;;  %891 = vrot.lane.b32.xlu1 %v889_v34, %s3106_s30 }
0x101b   :  { %239 = vrot.lane.b32.xlu1 %v3297_v38, %s3104_s4 }
0x1089   :  { %v892_v35 = vpop.permute.xlu1 %891 }
0x108a   :  { %894 = vst.msk [vmem:[#allocation3 + $0x14] sm:$0xf] %vm352_vm15, %v892_v35  ;;  %v897_v37 = vsel %vm203_vm13, %v892_v35, %v889_v34 }
0x108b   :  { %v898_v39 = vmul.f32 %v897_v37, %v3249_v26  ;;  %v1129_v37 = vld [vmem:[%s3837_s5 + $0x68] sm:$0xff] }
0x108d   :  { %2579 = vmatmul.mubr.msk.f32.vlgmr.msra.gmra.mrb[6].mxu1 %vm248_vm9, %v898_v39  ;;  %v240_v41 = vpop.permute.xlu1 %239  ;;  %v1131_v39 = vld [vmem:[%s3837_s5 + $0x78] sm:$0xff] }
0x108e   :  { %v241_v42 = vsel %vm203_vm13, %v238_v36, %v240_v41  ;;  %1238 = vmatprep.mubr.f32.mxu1 %v3101_v4  ;;  %v1128_v36 = vld [vmem:[%s3837_s5 + $0x60] sm:$0xff]  ;;  %v2885_v41 = vpack.c.bf16 %v1131_v39, %v1129_v37 }
0x108f   :  { %243 = vst.msk [vmem:[#allocation2 + $0x30] sm:$0xf0] %vm206_vm11, %v241_v42 }
0x1090   :  { %245 = vst.msk [vmem:[#allocation2 + $0x3c] sm:$0xf] %vm195_vm10, %v241_v42  ;;  %v1130_v42 = vld [vmem:[%s3837_s5 + $0x70] sm:$0xff] }
0x1096   :  { %v896_v46 = vld [vmem:[#allocation2 + $0x30] sm:$0xff] }
0x1097   :  { %v1004_v3 = vld [vmem:[#allocation2 + $0x38] sm:$0xff] }
0x1160   :  { %v968_v38 = vpop.f32.mrb[6].mxu1 }
0x1161   :  { %v969_v44 = vadd.f32 %v968_v38, %v3325_v51  ;;  %v2580_v45 = vpop.f32.mrb[7].mxu1  ;;  %v2887_v38 = vpack.c.bf16 %v1130_v42, %v1128_v36 }
0x1163   :  { %980 = vrot.lane.b32.xlu0 %v969_v44, %s3105_s29  ;;  %v972_v48 = vadd.f32 %v969_v44, %v896_v46 }
0x1165   :  { %v2270_v50 = vmul.f32 -1.442695, %v972_v48 }
0x1167   :  { %3040 = vpow2.f32 %v2270_v50 }
0x1171   :  { %v3041_v52 = vpop.eup %3040 }
0x1172   :  { %v976_v40 = vadd.f32 1.0, %v3041_v52  ;;  %v1132_v52 = vld [vmem:[%s3838_s6] sm:$0xff] }
0x1174   :  { %3042 = vrcp.f32 %v976_v40  ;;  %v1133_v40 = vld [vmem:[%s3838_s6 + $0x8] sm:$0xff] }
0x117e   :  { %v3043_v53 = vpop.eup %3042 }
0x117f   :  { %v990_v49 = vsub.f32 1.0, %v3043_v53  ;;  %v996_v58 = vmul.f32 %v3043_v53, %v889_v34  ;;  %v1126_v34 = vld [vmem:[%s3837_s5 + $0x50] sm:$0xff] }
0x1180   :  { %v2883_v35 = vpack.c.bf16 %v1126_v34, %v1124_v33 }
0x11d5   :  { %v981_v54 = vpop.permute.xlu0 %980 }
0x11d6   :  { %v983_v43 = vmul.f32 %v3043_v53, %v981_v54  ;;  %v1134_v53 = vld [vmem:[%s3838_s6 + $0x10] sm:$0xff]  ;;  %v3545_v54 = vpack.c.bf16 %v1133_v40, %v1132_v52 }
0x11d8   :  { %985 = vrot.lane.b32.xlu1 %v983_v43, %s3105_s29  ;;  %v1135_v43 = vld [vmem:[%s3838_s6 + $0x18] sm:$0xff] }
0x124a   :  { %v986_v47 = vpop.permute.xlu1 %985 }
0x124b   :  { %v988_v55 = vadd.f32 %v986_v47, %v896_v46 }
0x124d   :  { %3044 = vtanh.f32 %v988_v55  ;;  %v3551_v55 = vpack.c.bf16 %v1135_v43, %v1134_v53 }
0x1257   :  { %v3045_v56 = vpop.eup %3044 }
0x1258   :  { %992 = vrot.lane.b32.xlu0 %v3045_v56, %s3106_s30  ;;  %v1136_v56 = vld [vmem:[%s3838_s6 + $0x20] sm:$0xff] }
0x12ca   :  { %v993_v57 = vpop.permute.xlu0 %992 }
0x12cb   :  { %v995_v59 = vmul.f32 %v993_v57, %v990_v49  ;;  %v1137_v49 = vld [vmem:[%s3838_s6 + $0x28] sm:$0xff] }
0x12cc   :  { %v3563_v57 = vpack.c.bf16 %v1137_v49, %v1136_v56 }
0x12cd   :  { %v3469_v60 = vadd.f32 %v996_v58, %v995_v59  ;;  %v1138_v58 = vld [vmem:[%s3838_s6 + $0x30] sm:$0xff]  ;;  %v1139_v59 = vld [vmem:[%s3838_s6 + $0x38] sm:$0xff] }
0x12cf   :  { %1003 = vst.msk [vmem:[#allocation3] sm:$0xf0] %vm354_vm14, %v3469_v60  ;;  %999 = vrot.lane.b32.xlu1 %v3469_v60, %s3106_s30 }
0x1341   :  { %v1000_v61 = vpop.permute.xlu1 %999 }
0x1342   :  { %1002 = vst.msk [vmem:[#allocation3 + $0x18] sm:$0xf] %vm352_vm15, %v1000_v61  ;;  %v1005_v62 = vsel %vm203_vm13, %v1000_v61, %v3469_v60  ;;  %v3573_v61 = vpack.c.bf16 %v1139_v59, %v1138_v58 }
0x1343   :  { %v1006_v63 = vmul.f32 %v1005_v62, %v3249_v26  ;;  %v1113_v62 = vld [vmem:[#allocation3 + $0x8] sm:$0xff] }
0x1345   :  { %2598 = vmatmul.mubr.msk.f32.vlgmr.msra.gmra.mrb[14].mxu0 %vm248_vm9, %v1006_v63  ;;  %v1114_v63 = vld [vmem:[#allocation3 + $0x10] sm:$0xff] }
0x1346   :  { %2616 = vmatprep.mubr.msk.f32.mxu0 %vm3103_vm3, %v3101_v4  ;;  %2891 = vmatpush3.bf16.msra.mxu0 %v3545_v54 }
0x1347   :  { %2892 = vmatprep.subr.bf16.mxu0 %v3102_v10 }
0x134a   :  { %2894 = vmatpush3.bf16.msra.mxu0 %v3551_v55 }
0x134b   :  { %2895 = vmatprep.subr.bf16.mxu0 %v3102_v10 }
0x134e   :  { %2897 = vmatpush3.bf16.msra.mxu0 %v3563_v57 }
0x134f   :  { %2898 = vmatprep.subr.bf16.mxu0 %v3102_v10 }
0x1352   :  { %2900 = vmatpush3.bf16.msra.mxu0 %v3573_v61 }
0x1353   :  { %2913 = vmatprep.subr.bf16.mxu0 %v3102_v10 }
0x1355   :  { %2617 = vmatmul.mubr.msk.f32.vlgmr.msra.gmra.mrb[16].mxu0 %vm248_vm9, %v3262_v29 }
0x1356   :  { %2915 = vmatpush3.bf16.msra.mxu0 %v3545_v54  ;;  %2654 = vmatprep.mubr.msk.f32.mxu0 %vm3103_vm3, %v3101_v4 }
0x1357   :  { %2916 = vmatprep.subr.bf16.mxu0 %v3102_v10 }
0x135a   :  { %2918 = vmatpush3.bf16.msra.mxu0 %v3551_v55 }
0x135b   :  { %2919 = vmatprep.subr.bf16.mxu0 %v3102_v10 }
0x135e   :  { %2921 = vmatpush3.bf16.msra.mxu0 %v3563_v57 }
0x135f   :  { %2922 = vmatprep.subr.bf16.mxu0 %v3102_v10 }
0x1362   :  { %2924 = vmatpush3.bf16.msra.mxu0 %v3573_v61 }
0x1363   :  { %2937 = vmatprep.subr.bf16.mxu0 %v3102_v10 }
0x1418   :  { %v1076_v0 = vpop.f32.mrb[14].mxu0 }
0x1419   :  { %v1077_v1 = vadd.f32 %v1076_v0, %v3325_v51  ;;  %v2599_v2 = vpop.f32.mrb[15].mxu0  ;;  %v1119_v51 = vld [vmem:[%s3837_s5 + $0x18] sm:$0xff] }
0x141a   :  { %v2873_v14 = vpack.c.bf16 %v1119_v51, %v1117_v15 }
0x141b   :  { %1088 = vrot.lane.b32.xlu0 %v1077_v1, %s3105_s29  ;;  %v1080_v5 = vadd.f32 %v1077_v1, %v1004_v3  ;;  %v1140_v1 = vld [vmem:[%s3839_s7] sm:$0x3] }
0x141c   :  { %2874 = vmatprep.subr.bf16.mxu1 %v2873_v14  ;;  %v1155_v2 = vrot.slane %v1140_v1, %v3285_v30  ;;  %v1141_v14 = vld [vmem:[%s3840_s8] sm:$0x3]  ;;  %v3642_v18 = vrot.slane %v1140_v1, %v3288_v31 }
0x141d   :  { %v2272_v6 = vmul.f32 -1.442695, %v1080_v5  ;;  %2876 = vmatpush1.bf16.msra.mxu1 %v2875_v17  ;;  %v1145_v16 = vrot.slane %v1141_v14, %v3285_v30  ;;  %v1149_v17 = vrot.slane %v1141_v14, %v3288_v31 }
0x141e   :  { %2878 = vmatprep.subr.bf16.mxu1 %v2877_v22 }
0x141f   :  { %3046 = vpow2.f32 %v2272_v6  ;;  %v3645_v22 = vsel %vm73_vm12, %v1145_v16, %v1149_v17 }
0x1421   :  { %2880 = vmatpush1.bf16.msra.mxu1 %v2879_v23 }
0x1422   :  { %2882 = vmatprep.subr.bf16.mxu1 %v2881_v32 }
0x1425   :  { %2884 = vmatpush1.bf16.msra.mxu1 %v2883_v35 }
0x1426   :  { %2886 = vmatprep.subr.bf16.mxu1 %v2885_v41 }
0x1429   :  { %v3047_v7 = vpop.eup %3046  ;;  %2888 = vmatpush1.bf16.msra.mxu1 %v2887_v38 }
0x142a   :  { %v1084_v8 = vadd.f32 1.0, %v3047_v7  ;;  %2901 = vmatprep.subr.bf16.mxu1 %v3102_v10 }
0x142c   :  { %3048 = vrcp.f32 %v1084_v8 }
0x1436   :  { %v3049_v9 = vpop.eup %3048 }
0x1437   :  { %v1098_v45 = vsub.f32 1.0, %v3049_v9  ;;  %v1104_v48 = vmul.f32 %v3049_v9, %v3469_v60 }
0x148d   :  { %v1089_v11 = vpop.permute.xlu0 %1088 }
0x148e   :  { %v1091_v12 = vmul.f32 %v3049_v9, %v1089_v11  ;;  %v1378_v11 = vpop.f32.mrb[16].mxu0 }
0x148f   :  { %v1379_v30 = vadd.f32 %v1378_v11, %v3645_v22 }
0x1490   :  { %1093 = vrot.lane.b32.xlu1 %v1091_v12, %s3105_s29  ;;  %v2618_v12 = vpop.f32.mrb[17].mxu0 }
0x1502   :  { %v1094_v27 = vpop.permute.xlu1 %1093 }
0x1503   :  { %v1096_v24 = vadd.f32 %v1094_v27, %v1004_v3 }
0x1505   :  { %3050 = vtanh.f32 %v1096_v24 }
0x150f   :  { %v3051_v44 = vpop.eup %3050 }
0x1510   :  { %1100 = vrot.lane.b32.xlu0 %v3051_v44, %s3106_s30 }
0x1582   :  { %v1101_v46 = vpop.permute.xlu0 %1100 }
0x1583   :  { %v1103_v50 = vmul.f32 %v1101_v46, %v1098_v45 }
0x1585   :  { %v1105_v47 = vadd.f32 %v1104_v48, %v1103_v50 }
0x1587   :  { %1111 = vst.msk [vmem:[#allocation3 - $0x4] sm:$0xf0] %vm354_vm14, %v1105_v47  ;;  %1107 = vrot.lane.b32.xlu1 %v1105_v47, %s3106_s30 }
0x158e   :  { %v1112_v60 = vld [vmem:[#allocation3] sm:$0xff] }
0x158f   :  { %2273 = vmatmul.mubr.msk.f32.vlgmr.msra.gmra.mrb[8].mxu1 %vm248_vm9, %v1112_v60 }
0x1590   :  { %1244 = vmatprep.mubr.f32.mxu1 %v3101_v4  ;;  %2903 = vmatpush3.bf16.msra.mxu1 %v3545_v54 }
0x1591   :  { %2904 = vmatprep.subr.bf16.mxu1 %v3102_v10 }
0x1593   :  { %2274 = vmatmul.mubr.msk.f32.gmra.mrb[10].mxu1 %vm248_vm9, %v1113_v62 }
0x1594   :  { %1250 = vmatprep.mubr.f32.mxu1 %v3101_v4  ;;  %2906 = vmatpush3.bf16.msra.mxu1 %v3551_v55 }
0x1595   :  { %2907 = vmatprep.subr.bf16.mxu1 %v3102_v10 }
0x1597   :  { %2275 = vmatmul.mubr.msk.f32.gmra.mrb[12].mxu1 %vm248_vm9, %v1114_v63 }
0x1598   :  { %1256 = vmatprep.mubr.f32.mxu1 %v3101_v4  ;;  %2909 = vmatpush3.bf16.msra.mxu1 %v3563_v57 }
0x1599   :  { %2910 = vmatprep.subr.bf16.mxu1 %v3102_v10 }
0x159c   :  { %2912 = vmatpush3.bf16.msra.mxu1 %v3573_v61 }
0x159d   :  { %2925 = vmatprep.subr.bf16.mxu1 %v3102_v10 }
0x15f9   :  { %v1108_v29 = vpop.permute.xlu1 %1107 }
0x15fa   :  { %1110 = vst.msk [vmem:[#allocation3 + $0x1c] sm:$0xf] %vm352_vm15, %v1108_v29 }
0x1601   :  { %v1115_v0 = vld [vmem:[#allocation3 + $0x18] sm:$0xff] }
0x1602   :  { %2276 = vmatmul.mubr.msk.f32.gmra.mrb[14].mxu1 %vm248_vm9, %v1115_v0 }
0x1603   :  { %2635 = vmatprep.mubr.msk.f32.mxu1 %vm3103_vm3, %v3101_v4 }
0x1662   :  { %v1240_v3 = vpop.f32.mrb[8].mxu1 }
0x1663   :  { %v3612_v5 = vadd.f32 %v1240_v3, %v1155_v2  ;;  %v3614_v6 = vpop.f32.mrb[9].mxu1 }
0x1665   :  { %1263 = vst.msk [vmem:[#allocation2] sm:$0xf] %vm195_vm10, %v3612_v5 }
0x1666   :  { %1273 = vst.msk [vmem:[#allocation2 + $0x4] sm:$0xf0] %vm206_vm11, %v3612_v5  ;;  %v1246_v7 = vpop.f32.mrb[10].mxu1 }
0x1667   :  { %v3620_v8 = vadd.f32 %v1246_v7, %v1155_v2  ;;  %v3622_v9 = vpop.f32.mrb[11].mxu1 }
0x1669   :  { %1275 = vst.msk [vmem:[#allocation2 + $0x10] sm:$0xf] %vm195_vm10, %v3620_v8 }
0x166a   :  { %1285 = vst.msk [vmem:[#allocation2 + $0x14] sm:$0xf0] %vm206_vm11, %v3620_v8  ;;  %v1252_v15 = vpop.f32.mrb[12].mxu1 }
0x166b   :  { %v3628_v51 = vadd.f32 %v1252_v15, %v1155_v2  ;;  %v3630_v13 = vpop.f32.mrb[13].mxu1 }
0x166c   :  { %v1255_v14 = vadd.f32 %v3630_v13, %v3642_v18 }
0x166d   :  { %1287 = vst.msk [vmem:[#allocation2 + $0x20] sm:$0xf] %vm195_vm10, %v3628_v51 }
0x166e   :  { %1297 = vst.msk [vmem:[#allocation2 + $0x24] sm:$0xf0] %vm206_vm11, %v3628_v51 }
0x16d5   :  { %v1258_v19 = vpop.f32.mrb[14].mxu1 }
0x16d6   :  { %v1259_v20 = vadd.f32 %v1258_v19, %v1155_v2  ;;  %v1260_v21 = vpop.f32.mrb[15].mxu1 }
0x16d7   :  { %v1261_v27 = vadd.f32 %v1260_v21, %v3642_v18 }
0x16d8   :  { %1299 = vst.msk [vmem:[#allocation2 + $0x30] sm:$0xf] %vm195_vm10, %v1259_v20  ;;  %1266 = vrot.lane.b32.xlu0 %v1259_v20, %s3104_s4 }
0x16d9   :  { %1309 = vst.msk [vmem:[#allocation2 + $0x34] sm:$0xf0] %vm206_vm11, %v1259_v20  ;;  %1268 = vrot.lane.b32.xlu1 %v1261_v27, %s3104_s4 }
0x16dc   :  { %1390 = vrot.lane.b32.xlu0 %v1379_v30, %s3105_s29 }
0x174a   :  { %v1267_v31 = vpop.permute.xlu0 %1266 }
0x174b   :  { %v1269_v23 = vpop.permute.xlu1 %1268 }
0x174c   :  { %v1270_v24 = vsel %vm203_vm13, %v1267_v31, %v1269_v23 }
0x174d   :  { %1272 = vst.msk [vmem:[#allocation2] sm:$0xf0] %vm206_vm11, %v1270_v24 }
0x174e   :  { %1274 = vst.msk [vmem:[#allocation2 + $0xc] sm:$0xf] %vm195_vm10, %v1270_v24  ;;  %v1391_v35 = vpop.permute.xlu0 %1390 }
0x1754   :  { %v1311_v25 = vld [vmem:[#allocation2] sm:$0xff] }
0x1755   :  { %v1382_v28 = vadd.f32 %v1379_v30, %v1311_v25  ;;  %v1408_v56 = vld [vmem:[#allocation2 + $0x8] sm:$0xff] }
0x1757   :  { %v2278_v32 = vmul.f32 -1.442695, %v1382_v28 }
0x1759   :  { %3052 = vpow2.f32 %v2278_v32 }
0x1763   :  { %v3053_v33 = vpop.eup %3052 }
0x1764   :  { %v1386_v34 = vadd.f32 1.0, %v3053_v33 }
0x1766   :  { %3054 = vrcp.f32 %v1386_v34 }
0x1770   :  { %v3055_v37 = vpop.eup %3054 }
0x1771   :  { %v1393_v39 = vmul.f32 %v3055_v37, %v1391_v35  ;;  %v1400_v38 = vsub.f32 1.0, %v3055_v37  ;;  %v1406_v45 = vmul.f32 0.0, %v3055_v37 }
0x1773   :  { %1395 = vrot.lane.b32.xlu1 %v1393_v39, %s3105_s29 }
0x17e5   :  { %v1396_v36 = vpop.permute.xlu1 %1395 }
0x17e6   :  { %v1398_v41 = vadd.f32 %v1396_v36, %v1311_v25 }
0x17e8   :  { %3056 = vtanh.f32 %v1398_v41 }
0x17f2   :  { %v3057_v42 = vpop.eup %3056 }
0x17f3   :  { %1402 = vrot.lane.b32.xlu0 %v3057_v42, %s3106_s30 }
0x1865   :  { %v1403_v44 = vpop.permute.xlu0 %1402 }
0x1866   :  { %v1405_v46 = vmul.f32 %v1403_v44, %v1400_v38 }
0x1868   :  { %v3659_v48 = vadd.f32 %v1406_v45, %v1405_v46 }
0x186a   :  { %1410 = vrot.lane.b32.xlu1 %v3659_v48, %s3106_s30 }
0x18dc   :  { %v1411_v50 = vpop.permute.xlu1 %1410 }
0x18dd   :  { %v1413_v52 = vsel %vm203_vm13, %v1411_v50, %v3659_v48 }
0x18de   :  { %v1414_v40 = vmul.f32 %v1413_v52, %v3249_v26 }
0x18e0   :  { %2636 = vmatmul.mubr.msk.f32.vlgmr.msra.gmra.mrb[16].mxu1 %vm248_vm9, %v1414_v40 }
0x18e1   :  { %2927 = vmatpush3.bf16.msra.mxu1 %v3545_v54  ;;  %2673 = vmatprep.mubr.msk.f32.mxu1 %vm3103_vm3, %v3101_v4 }
0x18e2   :  { %2928 = vmatprep.subr.bf16.mxu1 %v3102_v10 }
0x18e5   :  { %2930 = vmatpush3.bf16.msra.mxu1 %v3551_v55 }
0x18e6   :  { %2931 = vmatprep.subr.bf16.mxu1 %v3102_v10 }
0x18e9   :  { %2933 = vmatpush3.bf16.msra.mxu1 %v3563_v57 }
0x18ea   :  { %2934 = vmatprep.subr.bf16.mxu1 %v3102_v10 }
0x18ed   :  { %2936 = vmatpush3.bf16.msra.mxu1 %v3573_v61 }
0x18ee   :  { %2949 = vmatprep.subr.bf16.mxu1 %v3102_v10 }
0x19b3   :  { %v1484_v53 = vpop.f32.mrb[16].mxu1 }
0x19b4   :  { %v1485_v43 = vadd.f32 %v1484_v53, %v3645_v22  ;;  %v2637_v47 = vpop.f32.mrb[17].mxu1 }
0x19b6   :  { %1496 = vrot.lane.b32.xlu0 %v1485_v43, %s3105_s29  ;;  %v1488_v49 = vadd.f32 %v1485_v43, %v1408_v56 }
0x19b8   :  { %v2280_v58 = vmul.f32 -1.442695, %v1488_v49 }
0x19ba   :  { %3058 = vpow2.f32 %v2280_v58 }
0x19c4   :  { %v3059_v59 = vpop.eup %3058 }
0x19c5   :  { %v1492_v60 = vadd.f32 1.0, %v3059_v59 }
0x19c7   :  { %3060 = vrcp.f32 %v1492_v60 }
0x19d1   :  { %v3061_v62 = vpop.eup %3060 }
0x19d2   :  { %v1506_v3 = vsub.f32 1.0, %v3061_v62  ;;  %v1512_v11 = vmul.f32 %v3061_v62, %v3659_v48 }
0x1a28   :  { %v1497_v63 = vpop.permute.xlu0 %1496 }
0x1a29   :  { %v1499_v29 = vmul.f32 %v3061_v62, %v1497_v63 }
0x1a2b   :  { %1501 = vrot.lane.b32.xlu1 %v1499_v29, %s3105_s29 }
0x1a9d   :  { %v1502_v0 = vpop.permute.xlu1 %1501 }
0x1a9e   :  { %v1504_v1 = vadd.f32 %v1502_v0, %v1408_v56 }
0x1aa0   :  { %3062 = vtanh.f32 %v1504_v1 }
0x1aaa   :  { %v3063_v2 = vpop.eup %3062 }
0x1aab   :  { %1508 = vrot.lane.b32.xlu0 %v3063_v2, %s3106_s30 }
0x1aaf   :  { %1278 = vrot.lane.b32.xlu0 %v3628_v51, %s3104_s4 }
0x1b1d   :  { %v1509_v7 = vpop.permute.xlu0 %1508 }
0x1b1e   :  { %v1511_v12 = vmul.f32 %v1509_v7, %v1506_v3 }
0x1b20   :  { %v1513_v15 = vadd.f32 %v1512_v11, %v1511_v12  ;;  %v1249_v12 = vadd.f32 %v3622_v9, %v3642_v18 }
0x1b21   :  { %v1279_v20 = vpop.permute.xlu0 %1278 }
0x1b22   :  { %1516 = vrot.lane.b32.xlu1 %v1513_v15, %s3106_s30 }
0x1b26   :  { %1280 = vrot.lane.b32.xlu1 %v1255_v14, %s3104_s4 }
0x1b94   :  { %v1517_v16 = vpop.permute.xlu1 %1516 }
0x1b95   :  { %v1519_v17 = vsel %vm203_vm13, %v1517_v16, %v1513_v15 }
0x1b96   :  { %v1520_v19 = vmul.f32 %v1519_v17, %v3249_v26 }
0x1b98   :  { %2655 = vmatmul.mubr.msk.f32.vlgmr.msra.gmra.mrb[18].mxu0 %vm248_vm9, %v1520_v19  ;;  %v1281_v51 = vpop.permute.xlu1 %1280 }
0x1b99   :  { %v1282_v21 = vsel %vm203_vm13, %v1279_v20, %v1281_v51  ;;  %2939 = vmatpush3.bf16.msra.mxu0 %v3545_v54  ;;  %2692 = vmatprep.mubr.msk.f32.mxu0 %vm3103_vm3, %v3101_v4 }
0x1b9a   :  { %1284 = vst.msk [vmem:[#allocation2 + $0x10] sm:$0xf0] %vm206_vm11, %v1282_v21  ;;  %2940 = vmatprep.subr.bf16.mxu0 %v3102_v10 }
0x1b9b   :  { %1286 = vst.msk [vmem:[#allocation2 + $0x1c] sm:$0xf] %vm195_vm10, %v1282_v21 }
0x1b9d   :  { %2942 = vmatpush3.bf16.msra.mxu0 %v3551_v55 }
0x1b9e   :  { %2943 = vmatprep.subr.bf16.mxu0 %v3102_v10 }
0x1ba1   :  { %2945 = vmatpush3.bf16.msra.mxu0 %v3563_v57  ;;  %v1514_v31 = vld [vmem:[#allocation2 + $0x10] sm:$0xff] }
0x1ba2   :  { %2946 = vmatprep.subr.bf16.mxu0 %v3102_v10  ;;  %v1620_v43 = vld [vmem:[#allocation2 + $0x18] sm:$0xff] }
0x1ba5   :  { %2948 = vmatpush3.bf16.msra.mxu0 %v3573_v61 }
0x1ba6   :  { %2961 = vmatprep.subr.bf16.mxu0 %v3102_v10 }
0x1c6b   :  { %v1590_v13 = vpop.f32.mrb[18].mxu0 }
0x1c6c   :  { %v1591_v27 = vadd.f32 %v1590_v13, %v3645_v22  ;;  %v2656_v30 = vpop.f32.mrb[19].mxu0 }
0x1c6e   :  { %1602 = vrot.lane.b32.xlu0 %v1591_v27, %s3105_s29  ;;  %v1594_v23 = vadd.f32 %v1591_v27, %v1514_v31 }
0x1c70   :  { %v2282_v24 = vmul.f32 -1.442695, %v1594_v23 }
0x1c72   :  { %3064 = vpow2.f32 %v2282_v24 }
0x1c7c   :  { %v3065_v25 = vpop.eup %3064 }
0x1c7d   :  { %v1598_v28 = vadd.f32 1.0, %v3065_v25 }
0x1c7f   :  { %3066 = vrcp.f32 %v1598_v28 }
0x1c89   :  { %v3067_v32 = vpop.eup %3066 }
0x1c8a   :  { %v1612_v36 = vsub.f32 1.0, %v3067_v32  ;;  %v1618_v42 = vmul.f32 %v3067_v32, %v1513_v15 }
0x1ce0   :  { %v1603_v33 = vpop.permute.xlu0 %1602 }
0x1ce1   :  { %v1605_v34 = vmul.f32 %v3067_v32, %v1603_v33 }
0x1ce3   :  { %1607 = vrot.lane.b32.xlu1 %v1605_v34, %s3105_s29 }
0x1d55   :  { %v1608_v35 = vpop.permute.xlu1 %1607 }
0x1d56   :  { %v1610_v37 = vadd.f32 %v1608_v35, %v1514_v31 }
0x1d58   :  { %3068 = vtanh.f32 %v1610_v37 }
0x1d62   :  { %v3069_v39 = vpop.eup %3068 }
0x1d63   :  { %1614 = vrot.lane.b32.xlu0 %v3069_v39, %s3106_s30 }
0x1dd5   :  { %v1615_v41 = vpop.permute.xlu0 %1614 }
0x1dd6   :  { %v1617_v38 = vmul.f32 %v1615_v41, %v1612_v36 }
0x1dd8   :  { %v1619_v44 = vadd.f32 %v1618_v42, %v1617_v38 }
0x1dda   :  { %1622 = vrot.lane.b32.xlu1 %v1619_v44, %s3106_s30 }
0x1e4c   :  { %v1623_v45 = vpop.permute.xlu1 %1622 }
0x1e4d   :  { %v1625_v46 = vsel %vm203_vm13, %v1623_v45, %v1619_v44 }
0x1e4e   :  { %v1626_v50 = vmul.f32 %v1625_v46, %v3249_v26 }
0x1e50   :  { %2674 = vmatmul.mubr.msk.f32.vlgmr.msra.gmra.mrb[18].mxu1 %vm248_vm9, %v1626_v50 }
0x1e51   :  { %2951 = vmatpush3.bf16.msra.mxu1 %v3545_v54  ;;  %2711 = vmatprep.mubr.msk.f32.mxu1 %vm3103_vm3, %v3101_v4 }
0x1e52   :  { %2952 = vmatprep.subr.bf16.mxu1 %v3102_v10 }
0x1e55   :  { %2954 = vmatpush3.bf16.msra.mxu1 %v3551_v55 }
0x1e56   :  { %2955 = vmatprep.subr.bf16.mxu1 %v3102_v10 }
0x1e59   :  { %2957 = vmatpush3.bf16.msra.mxu1 %v3563_v57 }
0x1e5a   :  { %2958 = vmatprep.subr.bf16.mxu1 %v3102_v10 }
0x1e5d   :  { %2960 = vmatpush3.bf16.msra.mxu1 %v3573_v61 }
0x1e5e   :  { %2973 = vmatprep.subr.bf16.mxu1 %v3102_v10 }
0x1f23   :  { %v1696_v52 = vpop.f32.mrb[18].mxu1 }
0x1f24   :  { %v1697_v40 = vadd.f32 %v1696_v52, %v3645_v22  ;;  %v2675_v53 = vpop.f32.mrb[19].mxu1 }
0x1f26   :  { %1708 = vrot.lane.b32.xlu0 %v1697_v40, %s3105_s29  ;;  %v1700_v47 = vadd.f32 %v1697_v40, %v1620_v43 }
0x1f28   :  { %v2284_v56 = vmul.f32 -1.442695, %v1700_v47 }
0x1f2a   :  { %3070 = vpow2.f32 %v2284_v56 }
0x1f34   :  { %v3071_v49 = vpop.eup %3070 }
0x1f35   :  { %v1704_v58 = vadd.f32 1.0, %v3071_v49 }
0x1f37   :  { %3072 = vrcp.f32 %v1704_v58 }
0x1f41   :  { %v3073_v59 = vpop.eup %3072 }
0x1f42   :  { %v1718_v1 = vsub.f32 1.0, %v3073_v59  ;;  %v1724_v3 = vmul.f32 %v3073_v59, %v1619_v44 }
0x1f98   :  { %v1709_v60 = vpop.permute.xlu0 %1708 }
0x1f99   :  { %v1711_v62 = vmul.f32 %v3073_v59, %v1709_v60 }
0x1f9b   :  { %1713 = vrot.lane.b32.xlu1 %v1711_v62, %s3105_s29 }
0x200d   :  { %v1714_v63 = vpop.permute.xlu1 %1713 }
0x200e   :  { %v1716_v29 = vadd.f32 %v1714_v63, %v1620_v43  ;;  %v1243_v63 = vadd.f32 %v3614_v6, %v3642_v18 }
0x2010   :  { %3074 = vtanh.f32 %v1716_v29 }
0x201a   :  { %v3075_v0 = vpop.eup %3074 }
0x201b   :  { %1720 = vrot.lane.b32.xlu0 %v3075_v0, %s3106_s30 }
0x201f   :  { %1290 = vrot.lane.b32.xlu0 %v3620_v8, %s3104_s4 }
0x208d   :  { %v1721_v2 = vpop.permute.xlu0 %1720 }
0x208e   :  { %v1723_v7 = vmul.f32 %v1721_v2, %v1718_v1 }
0x2090   :  { %v1725_v11 = vadd.f32 %v1724_v3, %v1723_v7 }
0x2091   :  { %v1291_v17 = vpop.permute.xlu0 %1290 }
0x2092   :  { %1728 = vrot.lane.b32.xlu1 %v1725_v11, %s3106_s30 }
0x2096   :  { %1292 = vrot.lane.b32.xlu1 %v1249_v12, %s3104_s4 }
0x2104   :  { %v1729_v15 = vpop.permute.xlu1 %1728 }
0x2105   :  { %v1731_v14 = vsel %vm203_vm13, %v1729_v15, %v1725_v11 }
0x2106   :  { %v1732_v16 = vmul.f32 %v1731_v14, %v3249_v26 }
0x2108   :  { %2693 = vmatmul.mubr.msk.f32.vlgmr.msra.gmra.mrb[20].mxu0 %vm248_vm9, %v1732_v16  ;;  %v1293_v8 = vpop.permute.xlu1 %1292 }
0x2109   :  { %v1294_v19 = vsel %vm203_vm13, %v1291_v17, %v1293_v8  ;;  %2963 = vmatpush3.bf16.msra.mxu0 %v3545_v54  ;;  %2730 = vmatprep.mubr.msk.f32.mxu0 %vm3103_vm3, %v3101_v4 }
0x210a   :  { %1296 = vst.msk [vmem:[#allocation2 + $0x20] sm:$0xf0] %vm206_vm11, %v1294_v19  ;;  %2964 = vmatprep.subr.bf16.mxu0 %v3102_v10 }
0x210b   :  { %1298 = vst.msk [vmem:[#allocation2 + $0x2c] sm:$0xf] %vm195_vm10, %v1294_v19 }
0x210d   :  { %2966 = vmatpush3.bf16.msra.mxu0 %v3551_v55 }
0x210e   :  { %2967 = vmatprep.subr.bf16.mxu0 %v3102_v10 }
0x2111   :  { %2969 = vmatpush3.bf16.msra.mxu0 %v3563_v57  ;;  %v1726_v21 = vld [vmem:[#allocation2 + $0x20] sm:$0xff] }
0x2112   :  { %2970 = vmatprep.subr.bf16.mxu0 %v3102_v10 }
0x2115   :  { %2972 = vmatpush3.bf16.msra.mxu0 %v3573_v61 }
0x2116   :  { %2985 = vmatprep.subr.bf16.mxu0 %v3102_v10 }
0x21db   :  { %v1802_v9 = vpop.f32.mrb[20].mxu0 }
0x21dc   :  { %v1803_v20 = vadd.f32 %v1802_v9, %v3645_v22  ;;  %v2694_v51 = vpop.f32.mrb[21].mxu0 }
0x21de   :  { %1814 = vrot.lane.b32.xlu0 %v1803_v20, %s3105_s29  ;;  %v1806_v13 = vadd.f32 %v1803_v20, %v1726_v21 }
0x21e0   :  { %v2286_v27 = vmul.f32 -1.442695, %v1806_v13 }
0x21e2   :  { %3076 = vpow2.f32 %v2286_v27 }
0x21ec   :  { %v3077_v30 = vpop.eup %3076 }
0x21ed   :  { %v1810_v31 = vadd.f32 1.0, %v3077_v30 }
0x21ef   :  { %3078 = vrcp.f32 %v1810_v31 }
0x21f9   :  { %v3079_v23 = vpop.eup %3078 }
0x21fa   :  { %v1824_v34 = vsub.f32 1.0, %v3079_v23  ;;  %v1830_v37 = vmul.f32 %v3079_v23, %v1725_v11 }
0x2250   :  { %v1815_v24 = vpop.permute.xlu0 %1814 }
0x2251   :  { %v1817_v25 = vmul.f32 %v3079_v23, %v1815_v24 }
0x2253   :  { %1819 = vrot.lane.b32.xlu1 %v1817_v25, %s3105_s29 }
0x22c5   :  { %v1820_v28 = vpop.permute.xlu1 %1819 }
0x22c6   :  { %v1822_v32 = vadd.f32 %v1820_v28, %v1726_v21 }
0x22c8   :  { %3080 = vtanh.f32 %v1822_v32 }
0x22d2   :  { %v3081_v33 = vpop.eup %3080 }
0x22d3   :  { %1826 = vrot.lane.b32.xlu0 %v3081_v33, %s3106_s30 }
0x2345   :  { %v1827_v35 = vpop.permute.xlu0 %1826 }
0x2346   :  { %v1829_v39 = vmul.f32 %v1827_v35, %v1824_v34 }
0x2348   :  { %v1831_v36 = vadd.f32 %v1830_v37, %v1829_v39 }
0x234a   :  { %1834 = vrot.lane.b32.xlu1 %v1831_v36, %s3106_s30 }
0x23bc   :  { %v1835_v41 = vpop.permute.xlu1 %1834 }
0x23bd   :  { %v1837_v42 = vsel %vm203_vm13, %v1835_v41, %v1831_v36 }
0x23be   :  { %v1838_v38 = vmul.f32 %v1837_v42, %v3249_v26 }
0x23c0   :  { %2712 = vmatmul.mubr.msk.f32.vlgmr.msra.gmra.mrb[20].mxu1 %vm248_vm9, %v1838_v38 }
0x23c1   :  { %2975 = vmatpush3.bf16.msra.mxu1 %v3545_v54  ;;  %2749 = vmatprep.mubr.msk.f32.mxu1 %vm3103_vm3, %v3101_v4  ;;  %v1832_v54 = vld [vmem:[#allocation2 + $0x28] sm:$0xff] }
0x23c2   :  { %2976 = vmatprep.subr.bf16.mxu1 %v3102_v10 }
0x23c5   :  { %2978 = vmatpush3.bf16.msra.mxu1 %v3551_v55 }
0x23c6   :  { %2979 = vmatprep.subr.bf16.mxu1 %v3102_v10 }
0x23c9   :  { %2981 = vmatpush3.bf16.msra.mxu1 %v3563_v57 }
0x23ca   :  { %2982 = vmatprep.subr.bf16.mxu1 %v3102_v10 }
0x23cd   :  { %2984 = vmatpush3.bf16.msra.mxu1 %v3573_v61 }
0x2493   :  { %v1908_v44 = vpop.f32.mrb[20].mxu1 }
0x2494   :  { %v1909_v45 = vadd.f32 %v1908_v44, %v3645_v22  ;;  %v2713_v46 = vpop.f32.mrb[21].mxu1  ;;  %v2158_v44 = vld [vmem:[%s3841_s9 + $0x8] sm:$0xff] }
0x2496   :  { %1920 = vrot.lane.b32.xlu0 %v1909_v45, %s3105_s29  ;;  %v1912_v50 = vadd.f32 %v1909_v45, %v1832_v54  ;;  %v2159_v45 = vld [vmem:[%s3841_s9 + $0x10] sm:$0xff] }
0x2498   :  { %v2288_v52 = vmul.f32 -1.442695, %v1912_v50 }
0x249a   :  { %3082 = vpow2.f32 %v2288_v52  ;;  %v2161_v52 = vld [vmem:[%s3841_s9 + $0x20] sm:$0xff] }
0x24a4   :  { %v3083_v40 = vpop.eup %3082 }
0x24a5   :  { %v1916_v55 = vadd.f32 1.0, %v3083_v40  ;;  %v2162_v40 = vld [vmem:[%s3841_s9 + $0x28] sm:$0xff] }
0x24a7   :  { %3084 = vrcp.f32 %v1916_v55 }
0x24b1   :  { %v3085_v53 = vpop.eup %3084 }
0x24b2   :  { %v1930_v49 = vsub.f32 1.0, %v3085_v53  ;;  %v1936_v59 = vmul.f32 %v3085_v53, %v1831_v36 }
0x2508   :  { %v1921_v43 = vpop.permute.xlu0 %1920 }
0x2509   :  { %v1923_v57 = vmul.f32 %v3085_v53, %v1921_v43  ;;  %v2992_v53 = vpack.c.bf16 %v2162_v40, %v2161_v52  ;;  %v2163_v43 = vld [vmem:[%s3841_s9 + $0x30] sm:$0xff] }
0x250b   :  { %1925 = vrot.lane.b32.xlu1 %v1923_v57, %s3105_s29  ;;  %v2164_v57 = vld [vmem:[%s3841_s9 + $0x38] sm:$0xff] }
0x257d   :  { %v1926_v47 = vpop.permute.xlu1 %1925 }
0x257e   :  { %v1928_v61 = vadd.f32 %v1926_v47, %v1832_v54  ;;  %v2160_v54 = vld [vmem:[%s3841_s9 + $0x18] sm:$0xff]  ;;  %v2995_v47 = vpack.c.bf16 %v2164_v57, %v2163_v43 }
0x257f   :  { %v2989_v50 = vpack.c.bf16 %v2160_v54, %v2159_v45 }
0x2580   :  { %3086 = vtanh.f32 %v1928_v61 }
0x258a   :  { %v3087_v56 = vpop.eup %3086 }
0x258b   :  { %1932 = vrot.lane.b32.xlu0 %v3087_v56, %s3106_s30 }
0x258f   :  { %1302 = vrot.lane.b32.xlu0 %v3612_v5, %s3104_s4 }
0x25fd   :  { %v1933_v58 = vpop.permute.xlu0 %1932 }
0x25fe   :  { %v1935_v60 = vmul.f32 %v1933_v58, %v1930_v49 }
0x2600   :  { %v1937_v62 = vadd.f32 %v1936_v59, %v1935_v60  ;;  %v2154_v60 = vrot.slane %v3659_v48, 4 }
0x2601   :  { %v1303_v2 = vpop.permute.xlu0 %1302 }
0x2602   :  { %1940 = vrot.lane.b32.xlu1 %v1937_v62, %s3106_s30 }
0x2606   :  { %1304 = vrot.lane.b32.xlu1 %v1243_v63, %s3104_s4 }
0x2674   :  { %v1941_v29 = vpop.permute.xlu1 %1940 }
0x2675   :  { %v1943_v0 = vsel %vm203_vm13, %v1941_v29, %v1937_v62  ;;  %v2293_v29 = vld [vmem:[%s3842_s10] ss:$0 sm:$0xff] }
0x2676   :  { %v1944_v1 = vmul.f32 %v1943_v0, %v3249_v26 }
0x2678   :  { %2731 = vmatmul.mubr.msk.f32.vlgmr.msra.gmra.mrb[22].mxu0 %vm248_vm9, %v1944_v1  ;;  %v1305_v5 = vpop.permute.xlu1 %1304 }
0x2679   :  { %v1306_v3 = vsel %vm203_vm13, %v1303_v2, %v1305_v5  ;;  %2768 = vmatprep.mubr.msk.f32.mxu0 %vm3103_vm3, %v3101_v4 }
0x267a   :  { %1308 = vst.msk [vmem:[#allocation2 + $0x30] sm:$0xf0] %vm206_vm11, %v1306_v3 }
0x267b   :  { %1310 = vst.msk [vmem:[#allocation2 + $0x3c] sm:$0xf] %vm195_vm10, %v1306_v3 }
0x2681   :  { %v1938_v11 = vld [vmem:[#allocation2 + $0x30] sm:$0xff] }
0x2682   :  { %v2044_v33 = vld [vmem:[#allocation2 + $0x38] sm:$0xff] }
0x274b   :  { %v2014_v6 = vpop.f32.mrb[22].mxu0 }
0x274c   :  { %v2015_v18 = vadd.f32 %v2014_v6, %v3645_v22  ;;  %v2732_v7 = vpop.f32.mrb[23].mxu0 }
0x274e   :  { %2026 = vrot.lane.b32.xlu0 %v2015_v18, %s3105_s29  ;;  %v2018_v12 = vadd.f32 %v2015_v18, %v1938_v11 }
0x2750   :  { %v2290_v15 = vmul.f32 -1.442695, %v2018_v12 }
0x2752   :  { %3088 = vpow2.f32 %v2290_v15 }
0x275c   :  { %v3089_v14 = vpop.eup %3088 }
0x275d   :  { %v2022_v16 = vadd.f32 1.0, %v3089_v14 }
0x275f   :  { %3090 = vrcp.f32 %v2022_v16 }
0x2769   :  { %v3091_v17 = vpop.eup %3090 }
0x276a   :  { %v2036_v51 = vsub.f32 1.0, %v3091_v17  ;;  %v2042_v13 = vmul.f32 %v3091_v17, %v1937_v62 }
0x27c0   :  { %v2027_v8 = vpop.permute.xlu0 %2026 }
0x27c1   :  { %v2029_v4 = vmul.f32 %v3091_v17, %v2027_v8 }
0x27c3   :  { %2031 = vrot.lane.b32.xlu1 %v2029_v4, %s3105_s29 }
0x2835   :  { %v2032_v19 = vpop.permute.xlu1 %2031 }
0x2836   :  { %v2034_v9 = vadd.f32 %v2032_v19, %v1938_v11 }
0x2838   :  { %3092 = vtanh.f32 %v2034_v9 }
0x2842   :  { %v3093_v20 = vpop.eup %3092 }
0x2843   :  { %2038 = vrot.lane.b32.xlu0 %v3093_v20, %s3106_s30 }
0x28b5   :  { %v2039_v21 = vpop.permute.xlu0 %2038 }
0x28b6   :  { %v2041_v27 = vmul.f32 %v2039_v21, %v2036_v51 }
0x28b8   :  { %v2043_v30 = vadd.f32 %v2042_v13, %v2041_v27 }
0x28ba   :  { %2046 = vrot.lane.b32.xlu1 %v2043_v30, %s3106_s30 }
0x292c   :  { %v2047_v31 = vpop.permute.xlu1 %2046 }
0x292d   :  { %v2049_v23 = vsel %vm203_vm13, %v2047_v31, %v2043_v30 }
0x292e   :  { %v2050_v24 = vmul.f32 %v2049_v23, %v3249_v26 }
0x2930   :  { %2750 = vmatmul.mubr.msk.f32.vlgmr.msra.gmra.mrb[22].mxu1 %vm248_vm9, %v2050_v24 }
0x2a03   :  { %v2120_v25 = vpop.f32.mrb[22].mxu1 }
0x2a04   :  { %v2121_v28 = vadd.f32 %v2120_v25, %v3645_v22  ;;  %v2751_v32 = vpop.f32.mrb[23].mxu1  ;;  %v2157_v22 = vld [vmem:[%s3841_s9] sm:$0xff] }
0x2a05   :  { %v2986_v46 = vpack.c.bf16 %v2158_v44, %v2157_v22 }
0x2a06   :  { %2132 = vrot.lane.b32.xlu0 %v2121_v28, %s3105_s29  ;;  %v2124_v34 = vadd.f32 %v2121_v28, %v2044_v33 }
0x2a07   :  { %2987 = vmatpush3.bf16.msra.mxu0 %v2986_v46 }
0x2a08   :  { %v2292_v35 = vmul.f32 -1.442695, %v2124_v34  ;;  %2988 = vmatprep.subr.bf16.mxu0 %v3102_v10 }
0x2a0a   :  { %3094 = vpow2.f32 %v2292_v35 }
0x2a0b   :  { %2990 = vmatpush3.bf16.msra.mxu0 %v2989_v50 }
0x2a0c   :  { %2991 = vmatprep.subr.bf16.mxu0 %v3102_v10 }
0x2a0f   :  { %2993 = vmatpush3.bf16.msra.mxu0 %v2992_v53 }
0x2a10   :  { %2994 = vmatprep.subr.bf16.mxu0 %v3102_v10 }
0x2a13   :  { %2996 = vmatpush3.bf16.msra.mxu0 %v2995_v47 }
0x2a14   :  { %v3095_v37 = vpop.eup %3094 }
0x2a15   :  { %v2128_v39 = vadd.f32 1.0, %v3095_v37 }
0x2a17   :  { %3096 = vrcp.f32 %v2128_v39 }
0x2a21   :  { %v3097_v36 = vpop.eup %3096 }
0x2a22   :  { %v2142_v61 = vsub.f32 1.0, %v3097_v36  ;;  %v2148_v49 = vmul.f32 %v3097_v36, %v2043_v30 }
0x2a78   :  { %v2133_v41 = vpop.permute.xlu0 %2132 }
0x2a79   :  { %v2135_v42 = vmul.f32 %v3097_v36, %v2133_v41 }
0x2a7b   :  { %2137 = vrot.lane.b32.xlu1 %v2135_v42, %s3105_s29 }
0x2aed   :  { %v2138_v26 = vpop.permute.xlu1 %2137 }
0x2aee   :  { %v2140_v38 = vadd.f32 %v2138_v26, %v2044_v33 }
0x2af0   :  { %3098 = vtanh.f32 %v2140_v38 }
0x2afa   :  { %v3099_v55 = vpop.eup %3098 }
0x2afb   :  { %2144 = vrot.lane.b32.xlu0 %v3099_v55, %s3106_s30 }
0x2b6d   :  { %v2145_v56 = vpop.permute.xlu0 %2144 }
0x2b6e   :  { %v2147_v58 = vmul.f32 %v2145_v56, %v2142_v61 }
0x2b70   :  { %v2149_v59 = vadd.f32 %v2148_v49, %v2147_v58 }
0x2b72   :  { %2151 = vrot.lane.b32.xlu1 %v2149_v59, %s3106_s30 }
0x2be4   :  { %v2152_v62 = vpop.permute.xlu1 %2151 }
0x2be5   :  { %v2156_v63 = vsel %vm203_vm13, %v2152_v62, %v2154_v60 }
0x2be6   :  { %2769 = vmatmul.mubr.msk.f32.vlgmr.msra.gmra.mrb[24].mxu0 %vm248_vm9, %v2156_v63 }
0x2cb9   :  { %v2241_v10 = vpop.f32.mrb[24].mxu0 }
0x2cba   :  { %v2242_v0 = vadd.f32 %v2293_v29, %v2241_v10  ;;  %v2770_v1 = vpop.f32.mrb[25].mxu0 }
0x2cbc   :  { %2246 = vst.msk [vmem:[%s3843_s11] sm:$0xf] %vm2245_vm0, %v2242_v0 }

</bundles_post_ra>
